<compile_context>
chip_gen: v5e
topology: v5e:2x2
jax: 0.10.0
libtpu: 0.0.40
codegen_flags: <defaults>
</compile_context>

<pallas_src>
import math

import jax
import jax.numpy as jnp
from jax.experimental import pallas as pl
from jax.experimental.pallas import tpu as pltpu


def _round_up(x, m):
    return (x + m - 1) // m * m


def _make_kernel(half):
    """half = freq_dim // 2 (actual, un-padded)."""
    neg_log_over_half = -math.log(10000.0) / half

    def kernel(t_ref, w1c_ref, w1s_ref, b1_ref, w2_ref, b2_ref, o_ref, h_ref):
        # Layer 1 (full width) once per batch tile, reused for every N tile.
        @pl.when(pl.program_id(1) == 0)
        def _():
            half_pad = w1c_ref.shape[0]
            w_dtype = w1c_ref.dtype

            # Frequency table computed in-kernel: one lane-dense (1, half_pad)
            # row.  exp() runs on the EUP slot; padded columns (k >= half) only
            # multiply zero weight rows, so they contribute nothing.
            k = jax.lax.broadcasted_iota(jnp.int32, (1, half_pad), 1)
            freqs = jnp.exp(k.astype(jnp.float32) * neg_log_over_half)

            # args[b, j] = t[b] * freqs[j]              -> (block_b, half_pad)
            args = t_ref[...] * freqs
            cos_e = jnp.cos(args)                       # f32 (v5e-friendly)
            sin_e = jnp.sin(args)

            # Linear 1 as two accumulating dots (no concat), f32 accumulation.
            h = jnp.dot(cos_e.astype(w_dtype), w1c_ref[...],
                        preferred_element_type=jnp.float32)
            h = h + jnp.dot(sin_e.astype(w_dtype), w1s_ref[...],
                            preferred_element_type=jnp.float32)
            h = h + b1_ref[...]

            # SiLU in f32 on the VPU/EUP.
            h_ref[...] = h * jax.nn.sigmoid(h)

        # Linear 2 for this N tile, f32 accumulation, lane-dense store.
        out = jnp.dot(h_ref[...].astype(w2_ref.dtype), w2_ref[...],
                      preferred_element_type=jnp.float32) + b2_ref[...]
        o_ref[...] = out.astype(o_ref.dtype)

    return kernel


def prepare_timestep_embedder_params(w1, b1, w2, b2, freq_dim=256, *,
                                     compute_dtype=jnp.bfloat16):
    """Pads + casts the MLP weights once.  Cache the result across calls.

    w1: [freq_dim, dim], b1: [dim], w2: [dim, dim], b2: [dim].
    W1 is split into cos / sin halves.  When freq_dim is odd the reference
    appends a zero column to the embedding; that column only multiplies W1's
    last row, so dropping that row reproduces the exact result.
    """
    dim = w1.shape[1]
    half = freq_dim // 2
    half_pad = max(_round_up(half, 128), 128)
    dim_pad = max(_round_up(dim, 128), 128)

    w1c = jnp.pad(w1[:half].astype(compute_dtype),
                  ((0, half_pad - half), (0, dim_pad - dim)))
    w1s = jnp.pad(w1[half:2 * half].astype(compute_dtype),
                  ((0, half_pad - half), (0, dim_pad - dim)))
    w2p = jnp.pad(w2.astype(compute_dtype),
                  ((0, dim_pad - dim), (0, dim_pad - dim)))
    b1p = jnp.pad(b1.astype(jnp.float32), (0, dim_pad - dim)).reshape(1, dim_pad)
    b2p = jnp.pad(b2.astype(jnp.float32), (0, dim_pad - dim)).reshape(1, dim_pad)

    return {
        "w1c": w1c, "w1s": w1s, "b1": b1p, "w2": w2p, "b2": b2p,
        "half": half, "dim": dim, "half_pad": half_pad, "dim_pad": dim_pad,
    }


def _pick_tile_n(dim_pad, tile_n):
    if tile_n is not None:
        assert dim_pad % tile_n == 0 and tile_n % 128 == 0
        return tile_n
    if dim_pad <= 512:
        return dim_pad
    for cand in (512, 384, 256, 128):
        if dim_pad % cand == 0:
            return cand
    return dim_pad


def _vmem_budget_bytes(block_b, half_pad, dim_pad, tile_n, w_itemsize,
                       const_bufs, stream_bufs):
    w1 = 2 * half_pad * dim_pad * w_itemsize * const_bufs
    b1 = dim_pad * 4 * const_bufs
    w2 = dim_pad * tile_n * w_itemsize * stream_bufs
    b2 = tile_n * 4 * stream_bufs
    t = block_b * 4 * 2
    out = block_b * tile_n * 4 * 2
    h_scratch = block_b * dim_pad * 4
    interm = block_b * (3 * half_pad + 2 * dim_pad) * 4   # args/cos/sin/h temps
    total = w1 + b1 + w2 + b2 + t + out + h_scratch + interm
    # 1.5x headroom; at least the v6e/v7x scoped default, capped at v7x physical.
    return int(min(max(total * 3 // 2, 32 * 1024 * 1024), 64 * 1024 * 1024))


def timestep_embedder_apply(t, params, *, block_b=None, tile_n=None,
                            out_dtype=jnp.float32):
    """t: [B] float32.  Returns [B, dim] in out_dtype (f32 default; pass bf16
    if the consumer accepts it, halving output HBM writeback)."""
    B = t.shape[0]
    half = params["half"]
    dim = params["dim"]
    half_pad = params["half_pad"]
    dim_pad = params["dim_pad"]
    w_itemsize = jnp.dtype(params["w2"].dtype).itemsize

    # Small inference batches don't pad to 128 rows; large batches tile at 128
    # (consider 256 on v6e/v7x for training-size B if MXU-bound).
    if block_b is None:
        block_b = min(128, max(16, _round_up(B, 16)))
    B_pad = max(_round_up(B, block_b), block_b)
    n_b = B_pad // block_b

    tile_n = _pick_tile_n(dim_pad, tile_n)
    n_n = dim_pad // tile_n
    w2_is_constant = (n_n == 1)

    # Timesteps as a padded column; padded rows produce finite garbage
    # (cos(0)=1, sin(0)=0) that is sliced off below.
    t_col = jnp.pad(t.astype(jnp.float32), (0, B_pad - B)).reshape(B_pad, 1)

    def run(single_buffer_weights):
        def wspec(shape, index_map, constant):
            if constant and single_buffer_weights:
                return pl.BlockSpec(shape, index_map,
                                    pipeline_mode=pl.Buffered(1))
            return pl.BlockSpec(shape, index_map)

        const_bufs = 1 if single_buffer_weights else 2
        stream_bufs = const_bufs if w2_is_constant else 2

        return pl.pallas_call(
            _make_kernel(half),
            out_shape=jax.ShapeDtypeStruct((B_pad, dim_pad), out_dtype),
            grid=(n_b, n_n),
            in_specs=[
                pl.BlockSpec((block_b, 1), lambda i, n: (i, 0)),            # t col
                wspec((half_pad, dim_pad), lambda i, n: (0, 0), True),      # W1 cos half
                wspec((half_pad, dim_pad), lambda i, n: (0, 0), True),      # W1 sin half
                wspec((1, dim_pad), lambda i, n: (0, 0), True),             # b1 row
                wspec((dim_pad, tile_n), lambda i, n: (0, n), w2_is_constant),  # W2 N-tile
                wspec((1, tile_n), lambda i, n: (0, n), w2_is_constant),        # b2 N-tile
            ],
            out_specs=pl.BlockSpec((block_b, tile_n), lambda i, n: (i, n)),
            scratch_shapes=[pltpu.VMEM((block_b, dim_pad), jnp.float32)],   # layer-1 h
            compiler_params=pltpu.CompilerParams(
                dimension_semantics=("parallel", "arbitrary"),
                vmem_limit_bytes=_vmem_budget_bytes(
                    block_b, half_pad, dim_pad, tile_n, w_itemsize,
                    const_bufs, stream_bufs)),
        )(t_col, params["w1c"], params["w1s"], params["b1"],
          params["w2"], params["b2"])

    if hasattr(pl, "Buffered"):
        try:
            out = run(single_buffer_weights=True)
        except Exception:
            # Installed Pallas rejects Buffered(1) on this path; default
            # double-buffering is correct, just uses more VMEM.
            out = run(single_buffer_weights=False)
    else:
        out = run(single_buffer_weights=False)

    return out[:B, :dim]


def timestep_embedder(t, w1, b1, w2, b2, freq_dim=256, **kwargs):
    """One-shot convenience wrapper.  For per-step diffusion loops, call
    prepare_timestep_embedder_params() once and timestep_embedder_apply()
    per step so the weight pad/cast isn't redone every call."""
    params = prepare_timestep_embedder_params(w1, b1, w2, b2, freq_dim=freq_dim)
    return timestep_embedder_apply(t, params, **kwargs)


def _reference(t, w1, b1, w2, b2, freq_dim=256):
    """Pure-f32 JAX port of the PyTorch module's forward."""
    half = freq_dim // 2
    freqs = jnp.exp(-math.log(10000.0) *
                    jnp.arange(0, half, dtype=jnp.float32) / half)
    args = t[:, None] * freqs[None, :]
    emb = jnp.concatenate([jnp.cos(args), jnp.sin(args)], axis=-1)
    if freq_dim % 2:
        emb = jnp.concatenate([emb, jnp.zeros_like(emb[:, :1])], axis=-1)
    h = emb @ w1 + b1
    h = h * jax.nn.sigmoid(h)
    return h @ w2 + b2


if __name__ == "__main__":
    key = jax.random.PRNGKey(0)
    k_t, k_w1, k_b1, k_w2, k_b2 = jax.random.split(key, 5)

    B = 8            # batch of scalar timesteps
    freq_dim = 256   # module default
    dim = 32         # embedding dim

    t = jax.random.uniform(k_t, (B,), dtype=jnp.float32) * 1000.0

    # Deterministic parameter init (Linear(freq_dim, dim) and Linear(dim, dim)).
    w1 = jax.random.normal(k_w1, (freq_dim, dim), jnp.float32) * (1.0 / math.sqrt(freq_dim))
    b1 = jax.random.normal(k_b1, (dim,), jnp.float32) * 0.01
    w2 = jax.random.normal(k_w2, (dim, dim), jnp.float32) * (1.0 / math.sqrt(dim))
    b2 = jax.random.normal(k_b2, (dim,), jnp.float32) * 0.01

    # Prepare (pad + cast) the weights once, then apply — the cached-params
    # path a diffusion sampling loop would use.
    params = prepare_timestep_embedder_params(w1, b1, w2, b2, freq_dim=freq_dim)
    out = timestep_embedder_apply(t, params)
    out = jax.block_until_ready(out)
    assert out.shape == (B, dim)

    # Compare against the full-f32 reference.  The kernel uses bf16 weights /
    # dot operands with f32 accumulation, so tolerance is set at bf16-matmul
    # precision; output magnitude here is O(0.5) and the bf16 rounding error
    # is O(1e-2), so this still catches any semantic bug (cos/sin order,
    # missing bias, wrong weight half, ...).
    ref = _reference(t, w1, b1, w2, b2, freq_dim=freq_dim)
    assert jnp.allclose(out, ref, atol=3e-2, rtol=3e-2), "mismatch vs reference"

    print("KERNEL_OK")
</pallas_src>

<mosaic_0001>
module attributes {stable_mosaic.version = 11 : i64} {
  func.func @kernel(%arg0: i32, %arg1: i32, %arg2: memref<16x1xf32, #tpu.memory_space<vmem>>, %arg3: memref<128x128xbf16, #tpu.memory_space<vmem>>, %arg4: memref<128x128xbf16, #tpu.memory_space<vmem>>, %arg5: memref<1x128xf32, #tpu.memory_space<vmem>>, %arg6: memref<128x128xbf16, #tpu.memory_space<vmem>>, %arg7: memref<1x128xf32, #tpu.memory_space<vmem>>, %arg8: memref<16x128xf32, #tpu.memory_space<vmem>>, %arg9: memref<16x128xf32, #tpu.memory_space<vmem>>) attributes {dimension_semantics = [#tpu.dimension_semantics<parallel>, #tpu.dimension_semantics<arbitrary>], iteration_bounds = array<i64: 1, 1>, scalar_prefetch = 0 : i64, scratch_operands = 1 : i64, tpu.core_type = #tpu.core_type<tc>, window_params = [{transform_indices = @transform_0, window_bounds = array<i64: 16, 1>}, {pipeline_mode = #tpu.pipeline_mode<synchronous>, transform_indices = @transform_1, window_bounds = array<i64: 128, 128>}, {pipeline_mode = #tpu.pipeline_mode<synchronous>, transform_indices = @transform_2, window_bounds = array<i64: 128, 128>}, {pipeline_mode = #tpu.pipeline_mode<synchronous>, transform_indices = @transform_3, window_bounds = array<i64: 1, 128>}, {pipeline_mode = #tpu.pipeline_mode<synchronous>, transform_indices = @transform_4, window_bounds = array<i64: 128, 128>}, {pipeline_mode = #tpu.pipeline_mode<synchronous>, transform_indices = @transform_5, window_bounds = array<i64: 1, 128>}, {transform_indices = @transform_6, window_bounds = array<i64: 16, 128>}]} {
    %c0_i32 = arith.constant 0 : i32
    %0 = arith.cmpi eq, %arg1, %c0_i32 : i32
    %1 = arith.extui %0 : i1 to i32
    %c0_i32_0 = arith.constant 0 : i32
    %2 = arith.cmpi ne, %1, %c0_i32_0 : i32
    scf.if %2 {
      %11 = tpu.iota {dimensions = array<i32: 1>} : vector<1x128xi32>
      %12 = arith.sitofp %11 : vector<1x128xi32> to vector<1x128xf32>
      %cst_8 = arith.constant -0.0719557852 : f32
      %13 = vector.broadcast %cst_8 : f32 to vector<1x128xf32>
      %14 = arith.mulf %12, %13 : vector<1x128xf32>
      %15 = math.exp %14 : vector<1x128xf32>
      %c0_9 = arith.constant 0 : index
      %c0_10 = arith.constant 0 : index
      %16 = vector.load %arg2[%c0_9, %c0_10] : memref<16x1xf32, #tpu.memory_space<vmem>>, vector<16x1xf32>
      %17 = vector.broadcast %16 : vector<16x1xf32> to vector<16x128xf32>
      %18 = vector.broadcast %15 : vector<1x128xf32> to vector<16x128xf32>
      %19 = arith.mulf %17, %18 : vector<16x128xf32>
      %20 = math.cos %19 : vector<16x128xf32>
      %21 = math.sin %19 : vector<16x128xf32>
      %22 = arith.truncf %20 : vector<16x128xf32> to vector<16x128xbf16>
      %c0_11 = arith.constant 0 : index
      %c0_12 = arith.constant 0 : index
      %23 = vector.load %arg3[%c0_11, %c0_12] : memref<128x128xbf16, #tpu.memory_space<vmem>>, vector<128x128xbf16>
      %cst_13 = arith.constant dense<0.000000e+00> : vector<16x128xf32>
      %24 = tpu.matmul %22, %23, %cst_13 {dimension_numbers = #tpu.dot_dimension_numbers<[1], [0], [0], [1], [0, 0, 1, 1], [], []>} : vector<16x128xbf16>, vector<128x128xbf16>, vector<16x128xf32> -> vector<16x128xf32>
      %25 = arith.truncf %21 : vector<16x128xf32> to vector<16x128xbf16>
      %c0_14 = arith.constant 0 : index
      %c0_15 = arith.constant 0 : index
      %26 = vector.load %arg4[%c0_14, %c0_15] : memref<128x128xbf16, #tpu.memory_space<vmem>>, vector<128x128xbf16>
      %cst_16 = arith.constant dense<0.000000e+00> : vector<16x128xf32>
      %27 = tpu.matmul %25, %26, %cst_16 {dimension_numbers = #tpu.dot_dimension_numbers<[1], [0], [0], [1], [0, 0, 1, 1], [], []>} : vector<16x128xbf16>, vector<128x128xbf16>, vector<16x128xf32> -> vector<16x128xf32>
      %28 = arith.addf %24, %27 : vector<16x128xf32>
      %c0_17 = arith.constant 0 : index
      %c0_18 = arith.constant 0 : index
      %29 = vector.load %arg5[%c0_17, %c0_18] : memref<1x128xf32, #tpu.memory_space<vmem>>, vector<1x128xf32>
      %30 = vector.broadcast %29 : vector<1x128xf32> to vector<16x128xf32>
      %31 = arith.addf %28, %30 : vector<16x128xf32>
      %32 = arith.negf %31 : vector<16x128xf32>
      %33 = math.exp %32 : vector<16x128xf32>
      %cst_19 = arith.constant 1.000000e+00 : f32
      %34 = vector.broadcast %cst_19 : f32 to vector<16x128xf32>
      %35 = arith.addf %34, %33 : vector<16x128xf32>
      %36 = arith.divf %34, %35 : vector<16x128xf32>
      %37 = arith.mulf %31, %36 : vector<16x128xf32>
      %c0_20 = arith.constant 0 : index
      %c0_21 = arith.constant 0 : index
      %38 = vector.load %arg9[%c0_20, %c0_21] : memref<16x128xf32, #tpu.memory_space<vmem>>, vector<16x128xf32>
      tpu.vector_store %arg9[%c0_20, %c0_21], %37 {strides = array<i32>} : memref<16x128xf32, #tpu.memory_space<vmem>>, vector<16x128xf32>,
    } else {
    }
    %c0 = arith.constant 0 : index
    %c0_1 = arith.constant 0 : index
    %3 = vector.load %arg9[%c0, %c0_1] : memref<16x128xf32, #tpu.memory_space<vmem>>, vector<16x128xf32>
    %4 = arith.truncf %3 : vector<16x128xf32> to vector<16x128xbf16>
    %c0_2 = arith.constant 0 : index
    %c0_3 = arith.constant 0 : index
    %5 = vector.load %arg6[%c0_2, %c0_3] : memref<128x128xbf16, #tpu.memory_space<vmem>>, vector<128x128xbf16>
    %cst = arith.constant dense<0.000000e+00> : vector<16x128xf32>
    %6 = tpu.matmul %4, %5, %cst {dimension_numbers = #tpu.dot_dimension_numbers<[1], [0], [0], [1], [0, 0, 1, 1], [], []>} : vector<16x128xbf16>, vector<128x128xbf16>, vector<16x128xf32> -> vector<16x128xf32>
    %c0_4 = arith.constant 0 : index
    %c0_5 = arith.constant 0 : index
    %7 = vector.load %arg7[%c0_4, %c0_5] : memref<1x128xf32, #tpu.memory_space<vmem>>, vector<1x128xf32>
    %8 = vector.broadcast %7 : vector<1x128xf32> to vector<16x128xf32>
    %9 = arith.addf %6, %8 : vector<16x128xf32>
    %c0_6 = arith.constant 0 : index
    %c0_7 = arith.constant 0 : index
    %10 = vector.load %arg8[%c0_6, %c0_7] : memref<16x128xf32, #tpu.memory_space<vmem>>, vector<16x128xf32>
    tpu.vector_store %arg8[%c0_6, %c0_7], %9 {strides = array<i32>} : memref<16x128xf32, #tpu.memory_space<vmem>>, vector<16x128xf32>,
    return
  }
  func.func @transform_0(%arg0: i32, %arg1: i32) -> (i32, i32) {
    %c0_i32 = arith.constant 0 : i32
    %c0_i32_0 = arith.constant 0 : i32
    return %arg0, %c0_i32 : i32, i32
  }
  func.func @transform_1(%arg0: i32, %arg1: i32) -> (i32, i32) {
    %c0_i32 = arith.constant 0 : i32
    %c0_i32_0 = arith.constant 0 : i32
    %c0_i32_1 = arith.constant 0 : i32
    return %c0_i32, %c0_i32_0 : i32, i32
  }
  func.func @transform_2(%arg0: i32, %arg1: i32) -> (i32, i32) {
    %c0_i32 = arith.constant 0 : i32
    %c0_i32_0 = arith.constant 0 : i32
    %c0_i32_1 = arith.constant 0 : i32
    return %c0_i32, %c0_i32_0 : i32, i32
  }
  func.func @transform_3(%arg0: i32, %arg1: i32) -> (i32, i32) {
    %c0_i32 = arith.constant 0 : i32
    %c0_i32_0 = arith.constant 0 : i32
    %c0_i32_1 = arith.constant 0 : i32
    return %c0_i32, %c0_i32_0 : i32, i32
  }
  func.func @transform_4(%arg0: i32, %arg1: i32) -> (i32, i32) {
    %c0_i32 = arith.constant 0 : i32
    %c0_i32_0 = arith.constant 0 : i32
    return %c0_i32, %arg1 : i32, i32
  }
  func.func @transform_5(%arg0: i32, %arg1: i32) -> (i32, i32) {
    %c0_i32 = arith.constant 0 : i32
    %c0_i32_0 = arith.constant 0 : i32
    return %c0_i32, %arg1 : i32, i32
  }
  func.func @transform_6(%arg0: i32, %arg1: i32) -> (i32, i32) {
    %c0_i32 = arith.constant 0 : i32
    return %arg0, %arg1 : i32, i32
  }
}

module attributes {stable_mosaic.version = 11 : i64} {
  func.func @kernel(%arg0: i32, %arg1: i32, %arg2: memref<16x1xf32, #tpu.memory_space<vmem>>, %arg3: memref<128x128xbf16, #tpu.memory_space<vmem>>, %arg4: memref<128x128xbf16, #tpu.memory_space<vmem>>, %arg5: memref<1x128xf32, #tpu.memory_space<vmem>>, %arg6: memref<128x128xbf16, #tpu.memory_space<vmem>>, %arg7: memref<1x128xf32, #tpu.memory_space<vmem>>, %arg8: memref<16x128xf32, #tpu.memory_space<vmem>>, %arg9: memref<16x128xf32, #tpu.memory_space<vmem>>) attributes {dimension_semantics = [#tpu.dimension_semantics<parallel>, #tpu.dimension_semantics<arbitrary>], iteration_bounds = array<i64: 1, 1>, scalar_prefetch = 0 : i64, scratch_operands = 1 : i64, tpu.core_type = #tpu.core_type<tc>, window_params = [{transform_indices = @transform_0, window_bounds = array<i64: 16, 1>}, {pipeline_mode = #tpu.pipeline_mode<synchronous>, transform_indices = @transform_1, window_bounds = array<i64: 128, 128>}, {pipeline_mode = #tpu.pipeline_mode<synchronous>, transform_indices = @transform_2, window_bounds = array<i64: 128, 128>}, {pipeline_mode = #tpu.pipeline_mode<synchronous>, transform_indices = @transform_3, window_bounds = array<i64: 1, 128>}, {transform_indices = @transform_4, window_bounds = array<i64: 128, 128>}, {transform_indices = @transform_5, window_bounds = array<i64: 1, 128>}, {transform_indices = @transform_6, window_bounds = array<i64: 16, 128>}]} {
    %c0_i32 = arith.constant 0 : i32
    %0 = arith.cmpi eq, %arg1, %c0_i32 : i32
    %1 = arith.extui %0 : i1 to i32
    %c0_i32_0 = arith.constant 0 : i32
    %2 = arith.cmpi ne, %1, %c0_i32_0 : i32
    scf.if %2 {
      %11 = tpu.iota {dimensions = array<i32: 1>} : vector<1x128xi32>
      %12 = arith.sitofp %11 : vector<1x128xi32> to vector<1x128xf32>
      %cst_8 = arith.constant -0.0719557852 : f32
      %13 = vector.broadcast %cst_8 : f32 to vector<1x128xf32>
      %14 = arith.mulf %12, %13 : vector<1x128xf32>
      %15 = math.exp %14 : vector<1x128xf32>
      %c0_9 = arith.constant 0 : index
      %c0_10 = arith.constant 0 : index
      %16 = vector.load %arg2[%c0_9, %c0_10] : memref<16x1xf32, #tpu.memory_space<vmem>>, vector<16x1xf32>
      %17 = vector.broadcast %16 : vector<16x1xf32> to vector<16x128xf32>
      %18 = vector.broadcast %15 : vector<1x128xf32> to vector<16x128xf32>
      %19 = arith.mulf %17, %18 : vector<16x128xf32>
      %20 = math.cos %19 : vector<16x128xf32>
      %21 = math.sin %19 : vector<16x128xf32>
      %22 = arith.truncf %20 : vector<16x128xf32> to vector<16x128xbf16>
      %c0_11 = arith.constant 0 : index
      %c0_12 = arith.constant 0 : index
      %23 = vector.load %arg3[%c0_11, %c0_12] : memref<128x128xbf16, #tpu.memory_space<vmem>>, vector<128x128xbf16>
      %cst_13 = arith.constant dense<0.000000e+00> : vector<16x128xf32>
      %24 = tpu.matmul %22, %23, %cst_13 {dimension_numbers = #tpu.dot_dimension_numbers<[1], [0], [0], [1], [0, 0, 1, 1], [], []>} : vector<16x128xbf16>, vector<128x128xbf16>, vector<16x128xf32> -> vector<16x128xf32>
      %25 = arith.truncf %21 : vector<16x128xf32> to vector<16x128xbf16>
      %c0_14 = arith.constant 0 : index
      %c0_15 = arith.constant 0 : index
      %26 = vector.load %arg4[%c0_14, %c0_15] : memref<128x128xbf16, #tpu.memory_space<vmem>>, vector<128x128xbf16>
      %cst_16 = arith.constant dense<0.000000e+00> : vector<16x128xf32>
      %27 = tpu.matmul %25, %26, %cst_16 {dimension_numbers = #tpu.dot_dimension_numbers<[1], [0], [0], [1], [0, 0, 1, 1], [], []>} : vector<16x128xbf16>, vector<128x128xbf16>, vector<16x128xf32> -> vector<16x128xf32>
      %28 = arith.addf %24, %27 : vector<16x128xf32>
      %c0_17 = arith.constant 0 : index
      %c0_18 = arith.constant 0 : index
      %29 = vector.load %arg5[%c0_17, %c0_18] : memref<1x128xf32, #tpu.memory_space<vmem>>, vector<1x128xf32>
      %30 = vector.broadcast %29 : vector<1x128xf32> to vector<16x128xf32>
      %31 = arith.addf %28, %30 : vector<16x128xf32>
      %32 = arith.negf %31 : vector<16x128xf32>
      %33 = math.exp %32 : vector<16x128xf32>
      %cst_19 = arith.constant 1.000000e+00 : f32
      %34 = vector.broadcast %cst_19 : f32 to vector<16x128xf32>
      %35 = arith.addf %34, %33 : vector<16x128xf32>
      %36 = arith.divf %34, %35 : vector<16x128xf32>
      %37 = arith.mulf %31, %36 : vector<16x128xf32>
      %c0_20 = arith.constant 0 : index
      %c0_21 = arith.constant 0 : index
      %38 = vector.load %arg9[%c0_20, %c0_21] : memref<16x128xf32, #tpu.memory_space<vmem>>, vector<16x128xf32>
      tpu.vector_store %arg9[%c0_20, %c0_21], %37 {strides = array<i32>} : memref<16x128xf32, #tpu.memory_space<vmem>>, vector<16x128xf32>,
    } else {
    }
    %c0 = arith.constant 0 : index
    %c0_1 = arith.constant 0 : index
    %3 = vector.load %arg9[%c0, %c0_1] : memref<16x128xf32, #tpu.memory_space<vmem>>, vector<16x128xf32>
    %4 = arith.truncf %3 : vector<16x128xf32> to vector<16x128xbf16>
    %c0_2 = arith.constant 0 : index
    %c0_3 = arith.constant 0 : index
    %5 = vector.load %arg6[%c0_2, %c0_3] : memref<128x128xbf16, #tpu.memory_space<vmem>>, vector<128x128xbf16>
    %cst = arith.constant dense<0.000000e+00> : vector<16x128xf32>
    %6 = tpu.matmul %4, %5, %cst {dimension_numbers = #tpu.dot_dimension_numbers<[1], [0], [0], [1], [0, 0, 1, 1], [], []>} : vector<16x128xbf16>, vector<128x128xbf16>, vector<16x128xf32> -> vector<16x128xf32>
    %c0_4 = arith.constant 0 : index
    %c0_5 = arith.constant 0 : index
    %7 = vector.load %arg7[%c0_4, %c0_5] : memref<1x128xf32, #tpu.memory_space<vmem>>, vector<1x128xf32>
    %8 = vector.broadcast %7 : vector<1x128xf32> to vector<16x128xf32>
    %9 = arith.addf %6, %8 : vector<16x128xf32>
    %c0_6 = arith.constant 0 : index
    %c0_7 = arith.constant 0 : index
    %10 = vector.load %arg8[%c0_6, %c0_7] : memref<16x128xf32, #tpu.memory_space<vmem>>, vector<16x128xf32>
    tpu.vector_store %arg8[%c0_6, %c0_7], %9 {strides = array<i32>} : memref<16x128xf32, #tpu.memory_space<vmem>>, vector<16x128xf32>,
    return
  }
  func.func @transform_0(%arg0: i32, %arg1: i32) -> (i32, i32) {
    %c0_i32 = arith.constant 0 : i32
    %c0_i32_0 = arith.constant 0 : i32
    return %arg0, %c0_i32 : i32, i32
  }
  func.func @transform_1(%arg0: i32, %arg1: i32) -> (i32, i32) {
    %c0_i32 = arith.constant 0 : i32
    %c0_i32_0 = arith.constant 0 : i32
    %c0_i32_1 = arith.constant 0 : i32
    return %c0_i32, %c0_i32_0 : i32, i32
  }
  func.func @transform_2(%arg0: i32, %arg1: i32) -> (i32, i32) {
    %c0_i32 = arith.constant 0 : i32
    %c0_i32_0 = arith.constant 0 : i32
    %c0_i32_1 = arith.constant 0 : i32
    return %c0_i32, %c0_i32_0 : i32, i32
  }
  func.func @transform_3(%arg0: i32, %arg1: i32) -> (i32, i32) {
    %c0_i32 = arith.constant 0 : i32
    %c0_i32_0 = arith.constant 0 : i32
    %c0_i32_1 = arith.constant 0 : i32
    return %c0_i32, %c0_i32_0 : i32, i32
  }
  func.func @transform_4(%arg0: i32, %arg1: i32) -> (i32, i32) {
    %c0_i32 = arith.constant 0 : i32
    %c0_i32_0 = arith.constant 0 : i32
    return %c0_i32, %arg1 : i32, i32
  }
  func.func @transform_5(%arg0: i32, %arg1: i32) -> (i32, i32) {
    %c0_i32 = arith.constant 0 : i32
    %c0_i32_0 = arith.constant 0 : i32
    return %c0_i32, %arg1 : i32, i32
  }
  func.func @transform_6(%arg0: i32, %arg1: i32) -> (i32, i32) {
    %c0_i32 = arith.constant 0 : i32
    return %arg0, %arg1 : i32, i32
  }
}

</mosaic_0001>

<bundles_post_ra>
// kernel: tpu_custom_call.1
= control target key start
LH: loop header
LB: loop body
LE: loop exit
PB: predicated region body
PF: predicated region fallthrough
CT: control target
= control target key end

     0   :  { %11 = vsyncpa [#allocation4], 0  ;;  %s1591_s0 = inlined_call_operand.vmem [shape: f32[16,1], index: 0, kind: input, shape index: {}]   ;;  %s1592_s1 = inlined_call_operand.hbm [shape: bf16[128,128], index: 1, kind: input, shape index: {}]   ;;  %s1593_s2 = inlined_call_operand.hbm [shape: bf16[128,128], index: 2, kind: input, shape index: {}]   ;;  %s1594_s3 = inlined_call_operand.vmem [shape: f32[1,128], index: 3, kind: input, shape index: {}]   ;;  %s1595_s4 = inlined_call_operand.hbm [shape: bf16[128,128], index: 4, kind: input, shape index: {}]   ;;  %s1596_s5 = inlined_call_operand.vmem [shape: f32[1,128], index: 5, kind: input, shape index: {}]   ;;  %s1597_s6 = inlined_call_operand.hbm [shape: f32[16,128], index: 6, kind: output, shape index: {}]  }
   0x1   :  { %12 = vsyncpa [#allocation7], 0 }
   0x2   :  { %13 = vsyncpa [#allocation5], 0  ;;  %s33_s23 = sshll.u32 %s1593_s2, 4  ;;  %s1290_s24 = smov [#allocation6]   ;;  %s34_s23 = int_to_ptr.hbm [resolvable:$true] %s33_s23 }
   0x3   :  { %s35_s25 = sshll.u32 %s1290_s24, 4  ;;  %s20_s28 = sshll.u32 %s1592_s1, 4  ;;  %s36_s25 = int_to_ptr.vmem [resolvable:$true] %s35_s25  ;;  %s21_s28 = int_to_ptr.hbm [resolvable:$true] %s20_s28 }
   0x4   :  { %s1291_s29 = smov 64   ;;  %s1292_s30 = smov 4  }
   0x5   :  { %41 = dma.hbm_to_vmem [thread:$0]  %s34_s23, 1024, %s36_s25, [#allocation7], %s1291_s29, %s1291_s29, %s1292_s30  }
   0x6   :  { %s1293_s7 = smov [#allocation3]   ;;  %s48_s11 = sshll.u32 %s1595_s4, 4  ;;  %s49_s11 = int_to_ptr.hbm [resolvable:$true] %s48_s11 }
   0x7   :  { %s22_s8 = sshll.u32 %s1293_s7, 4  ;;  %s1294_s2 = smov [#allocation8]   ;;  %s23_s8 = int_to_ptr.vmem [resolvable:$true] %s22_s8 }
   0x8   :  { %28 = dma.hbm_to_vmem [thread:$0]  %s21_s28, 1024, %s23_s8, [#allocation4], %s1291_s29, %s1291_s29, %s1292_s30  }
   0x9   :  { %s50_s12 = sshll.u32 %s1294_s2, 4  ;;  %s51_s12 = int_to_ptr.vmem [resolvable:$true] %s50_s12 }
   0xa   :  { %56 = dma.hbm_to_vmem [thread:$0]  %s49_s11, 1024, %s51_s12, [#allocation7], %s1291_s29, %s1291_s29, %s1292_s30  }
   0xb   :  { %1284 = dma.done.wait [#allocation4], 1024  }
   0xc   :  { %1285 = vsyncadd [#allocation4], 4294966272 }
   0xd   :  { %1286 = dma.done.wait [#allocation7], 2048  }
   0xe   :  { %1287 = vsyncadd [#allocation7], 4294965248  ;;  %v1295_v0 = vmov 0   ;;  %v81_v1 = vld [vmem:[%s1591_s0] sm:$0xff]  ;;  %v82_v2 = vld [vmem:[%s1591_s0 + $0x8] sm:$0xff]  ;;  %v75_v3 = vlaneseq  ;;  %s1302_s17 = smov [#allocation9]  }
   0xf   :  { %1175 = vset.pattern.permute.xlu0 %v1295_v0  ;;  %v1296_v27 = vmov 683565275   ;;  %v1297_v29 = vmov 2475754826   ;;  %v1298_v33 = vmov 2131351028  }
  0x10   :  { %85 = vperm.xlu0 %1175, %v81_v1   ;;  %v76_v4 = vand.u32 127, %v75_v3  ;;  %v1299_v36 = vmov 2102212464   ;;  %v1151_v38 = vld [vmem:[#allocation6 + $0x38] sm:$0xff]  ;;  %v1300_v41 = vmov 920167782  }
  0x11   :  { %v1143_v39 = vld [vmem:[#allocation3 + $0x38] sm:$0xff]  ;;  %v1301_v44 = vmov 1326507024   ;;  %795 = vmatpush.bf16.msra.mxu0 %v1151_v38  ;;  %v1150_v50 = vld [vmem:[#allocation6 + $0x30] sm:$0xff]  ;;  %v1149_v63 = vld [vmem:[#allocation6 + $0x28] sm:$0xff]  ;;  %s1010_s18 = sshll.u32 %s1302_s17, 4  ;;  %s1011_s18 = int_to_ptr.vmem [resolvable:$true] %s1010_s18 }
  0x12   :  { %v77_v5 = vcvt.s32.f32 %v76_v4  ;;  %857 = vmatpush.bf16.msra.mxu1 %v1143_v39  ;;  %v1142_v51 = vld [vmem:[#allocation3 + $0x30] sm:$0xff]  ;;  %s1012_s21 = sshll.u32 %s1597_s6, 4  ;;  %s1303_s22 = smov 128   ;;  %s1013_s21 = int_to_ptr.hbm [resolvable:$true] %s1012_s21 }
  0x13   :  { %s1304_s23 = smov 8  }
  0x14   :  { %v78_v6 = vmul.f32 -0.071955785, %v77_v5 }
  0x15   :  { %796 = vmatpush.bf16.msra.mxu0 %v1150_v50 }
  0x16   :  { %v79_v7 = vmul.f32 1.442695, %v78_v6  ;;  %858 = vmatpush.bf16.msra.mxu1 %v1142_v51 }
  0x18   :  { %90 = vperm.xlu0 %1175, %v82_v2   ;;  %1178 = vpow2.f32 %v79_v7  ;;  %v1141_v2 = vld [vmem:[#allocation3 + $0x28] sm:$0xff] }
  0x19   :  { %797 = vmatpush.bf16.msra.mxu0 %v1149_v63 }
  0x1a   :  { %859 = vmatpush.bf16.msra.mxu1 %v1141_v2  ;;  %v1145_v2 = vld [vmem:[#allocation6 + $0x8] sm:$0xff] }
  0x1e   :  { %v1179_v8 = vpop.eup %1178 }
  0x82   :  { %v86_v9 = vpop.permute.xlu0 %85 }
  0x83   :  { %v1356_v10 = vmul.f32 %v1179_v8, %v86_v9 }
  0x85   :  { %v98_v11 = vand.u32 2139095040, %v1356_v10  ;;  %v95_v13 = vand.u32 2147483647, %v1356_v10 }
  0x87   :  { %v99_v12 = vshrl.u32 %v98_v11, 23  ;;  %v102_v18 = vand.u32 8388607, %v95_v13 }
  0x89   :  { %v1026_v14 = vadd.s32 4294967169, %v99_v12  ;;  %v103_v23 = vor.u32 8388608, %v102_v18 }
  0x8a   :  { %v91_v15 = vpop.permute.xlu0 %90 }
  0x8b   :  { %v105_v16 = vadd.s32 1, %v1026_v14  ;;  %v1360_v17 = vmul.f32 %v1179_v8, %v91_v15  ;;  %v1385_v55 = vshll.u32 %v103_v23, 8  ;;  %v1148_v14 = vld [vmem:[#allocation6 + $0x20] sm:$0xff] }
  0x8c   :  { %798 = vmatpush.bf16.msra.mxu0 %v1148_v14 }
  0x8d   :  { %vm106_vm0 = vcmp.gt.s32.totalorder %v105_v16, 0  ;;  %v249_v20 = vand.u32 2147483647, %v1360_v17  ;;  %v252_v21 = vand.u32 2139095040, %v1360_v17  ;;  %v1403_v4 = vand.u32 65535, %v1385_v55 }
  0x8e   :  { %v107_v19 = vsel %vm106_vm0, %v105_v16, 0  ;;  %v1424_v18 = vshrl.u32 %v1385_v55, 16 }
  0x8f   :  { %v109_v22 = vand.u32 31, %v107_v19  ;;  %v253_v25 = vshrl.u32 %v252_v21, 23  ;;  %v1366_v26 = vshrl.u32 %v107_v19, 5  ;;  %v256_v31 = vand.u32 8388607, %v249_v20  ;;  %v1140_v19 = vld [vmem:[#allocation3 + $0x20] sm:$0xff] }
  0x90   :  { %860 = vmatpush.bf16.msra.mxu1 %v1140_v19 }
  0x91   :  { %v110_v24 = vsub.s32 32, %v109_v22  ;;  %v112_v28 = vshll.u32 %v1296_v27, %v109_v22  ;;  %v115_v30 = vshll.u32 %v1297_v29, %v109_v22  ;;  %v118_v35 = vshll.u32 %v1298_v33, %v109_v22 }
  0x92   :  { %v121_v40 = vshll.u32 %v1299_v36, %v109_v22  ;;  %v124_v43 = vshll.u32 %v1300_v41, %v109_v22  ;;  %v1029_v49 = vadd.s32 4294967169, %v253_v25  ;;  %vm127_vm1 = vcmp.lt.s32.totalorder %v1366_v26, 1 }
  0x93   :  { %v113_v32 = vshrl.u32 %v1297_v29, %v110_v24  ;;  %v116_v34 = vshrl.u32 %v1298_v33, %v110_v24  ;;  %v119_v37 = vshrl.u32 %v1299_v36, %v110_v24  ;;  %v122_v42 = vshrl.u32 %v1300_v41, %v110_v24 }
  0x94   :  { %v125_v45 = vshrl.u32 %v1301_v44, %v110_v24  ;;  %vm129_vm2 = vcmp.lt.s32.totalorder %v1366_v26, 3  ;;  %vm130_vm3 = vcmp.lt.s32.totalorder %v1366_v26, 4  ;;  %v257_v58 = vor.u32 8388608, %v256_v31 }
  0x95   :  { %v114_v46 = vor.u32 %v113_v32, %v112_v28  ;;  %v117_v47 = vor.u32 %v116_v34, %v115_v30  ;;  %v120_v48 = vor.u32 %v119_v37, %v118_v35  ;;  %v123_v52 = vor.u32 %v122_v42, %v121_v40  ;;  %v1147_v37 = vld [vmem:[#allocation6 + $0x18] sm:$0xff] }
  0x96   :  { %v126_v53 = vor.u32 %v125_v45, %v124_v43  ;;  %v259_v59 = vadd.s32 1, %v1029_v49  ;;  %vm128_vm4 = vcmp.lt.s32.totalorder %v1366_v26, 2  ;;  %v111_v7 = vshrl.u32 %v1296_v27, %v110_v24  ;;  %v1139_v43 = vld [vmem:[#allocation3 + $0x18] sm:$0xff]  ;;  %799 = vmatpush.bf16.msra.mxu0 %v1147_v37 }
  0x97   :  { %v139_v54 = vsel %vm127_vm1, %v117_v47, %v120_v48  ;;  %v136_v56 = vsel %vm130_vm3, %v123_v52, 920167782  ;;  %v135_v60 = vsel %vm127_vm1, %v114_v46, %v117_v47  ;;  %v132_v3 = vsel %vm130_vm3, %v120_v48, 2102212464  ;;  %861 = vmatpush.bf16.msra.mxu1 %v1139_v43 }
  0x98   :  { %v140_v57 = vsel %vm130_vm3, %v126_v53, 1326507024  ;;  %v137_v61 = vsel %vm129_vm2, %v120_v48, %v136_v56  ;;  %vm260_vm5 = vcmp.gt.s32.totalorder %v259_v59, 0  ;;  %v1410_v11 = vshll.u32 %v257_v58, 8 }
  0x99   :  { %v141_v62 = vsel %vm129_vm2, %v123_v52, %v140_v57  ;;  %v1408_v8 = vsel %vm128_vm4, %v135_v60, %v137_v61  ;;  %v261_v9 = vsel %vm260_vm5, %v259_v59, 0  ;;  %v1417_v15 = vsel %vm127_vm1, %v111_v7, %v114_v46 }
  0x9a   :  { %v142_v1 = vsel %vm128_vm4, %v139_v54, %v141_v62  ;;  %v1421_v16 = vsel %vm129_vm2, %v117_v47, %v132_v3  ;;  %v168_v23 = vand.u32 65535, %v1408_v8  ;;  %v263_v24 = vand.u32 31, %v261_v9 }
  0x9b   :  { %v146_v5 = vand.u32 65535, %v142_v1  ;;  %v147_v6 = vshrl.u32 %v142_v1, 16  ;;  %v169_v28 = vshrl.u32 %v1408_v8, 16  ;;  %v1434_v30 = vand.u32 65535, %v1410_v11 }
  0x9c   :  { %v1437_v31 = vshrl.u32 %v1410_v11, 16  ;;  %v1440_v34 = vshrl.u32 %v261_v9, 5  ;;  %v1442_v35 = vsub.s32 32, %v263_v24  ;;  %v266_v40 = vshll.u32 %v1296_v27, %v263_v24  ;;  %v1137_v9 = vld [vmem:[#allocation3 + $0x8] sm:$0xff] }
  0x9d   :  { %v1413_v12 = vmul.u32 %v147_v6, %v1403_v4  ;;  %v148_v21 = vmul.u32 %v146_v5, %v1403_v4  ;;  %v1430_v25 = vmul.u32 %v146_v5, %v1424_v18  ;;  %v151_v32 = vmul.u32 %v147_v6, %v1424_v18 }
  0x9e   :  { %v269_v42 = vshll.u32 %v1297_v29, %v263_v24  ;;  %v267_v45 = vshrl.u32 %v1297_v29, %v1442_v35  ;;  %v270_v46 = vshrl.u32 %v1298_v33, %v1442_v35  ;;  %v272_v47 = vshll.u32 %v1298_v33, %v263_v24  ;;  %v1146_v33 = vld [vmem:[#allocation6 + $0x10] sm:$0xff] }
  0x9f   :  { %v152_v22 = vshll.u32 %v1413_v12, 16  ;;  %v275_v48 = vshll.u32 %v1299_v36, %v263_v24  ;;  %v273_v49 = vshrl.u32 %v1299_v36, %v1442_v35  ;;  %v276_v50 = vshrl.u32 %v1300_v41, %v1442_v35  ;;  %800 = vmatpush.bf16.msra.mxu0 %v1146_v33 }
  0xa0   :  { %v278_v51 = vshll.u32 %v1300_v41, %v263_v24  ;;  %v279_v52 = vshrl.u32 %v1301_v44, %v1442_v35  ;;  %v154_v29 = vshll.u32 %v1430_v25, 16  ;;  %v1461_v54 = vor.u32 %v267_v45, %v266_v40  ;;  %v1138_v41 = vld [vmem:[#allocation3 + $0x10] sm:$0xff]  ;;  %v1144_v45 = vld [vmem:[#allocation6] sm:$0xff] }
  0xa1   :  { %vm156_vm6 = vc.u32 %v148_v21, %v152_v22  ;;  %v158_v39 = vadd.s32 %v152_v22, %v148_v21  ;;  %v1463_v56 = vor.u32 %v270_v46, %v269_v42  ;;  %v1465_v57 = vor.u32 %v273_v49, %v272_v47  ;;  %862 = vmatpush.bf16.msra.mxu1 %v1138_v41 }
  0xa2   :  { %v157_v38 = vsel %vm156_vm6, 1, %v1295_v0  ;;  %v277_v36 = vor.u32 %v276_v50, %v275_v48  ;;  %v280_v58 = vor.u32 %v279_v52, %v278_v51  ;;  %vm281_vm7 = vcmp.lt.s32.totalorder %v1440_v34, 1 }
  0xa3   :  { %v159_v53 = vadd.s32 %v157_v38, %v151_v32  ;;  %v1471_v44 = vmul.u32 %v169_v28, %v1403_v4  ;;  %vm284_vm8 = vcmp.lt.s32.totalorder %v1440_v34, 4  ;;  %v289_v59 = vsel %vm281_vm7, %v1461_v54, %v1463_v56  ;;  %801 = vmatpush.bf16.msra.mxu0 %v1145_v2 }
  0xa4   :  { %vm160_vm9 = vc.u32 %v158_v39, %v154_v29  ;;  %vm283_vm10 = vcmp.lt.s32.totalorder %v1440_v34, 3  ;;  %v290_v60 = vsel %vm284_vm8, %v277_v36, 920167782  ;;  %v293_v61 = vsel %vm281_vm7, %v1463_v56, %v1465_v57 }
  0xa5   :  { %v294_v62 = vsel %vm284_vm8, %v280_v58, 1326507024  ;;  %vm282_vm11 = vcmp.lt.s32.totalorder %v1440_v34, 2  ;;  %v291_v63 = vsel %vm283_vm10, %v1465_v57, %v290_v60  ;;  %v161_v3 = vsel %vm160_vm9, 1, %v1295_v0  ;;  %863 = vmatpush.bf16.msra.mxu1 %v1137_v9 }
  0xa6   :  { %v295_v1 = vsel %vm283_vm10, %v277_v36, %v294_v62  ;;  %v1497_v5 = vmul.u32 %v168_v23, %v1424_v18  ;;  %v292_v6 = vsel %vm282_vm11, %v289_v59, %v291_v63  ;;  %v163_v14 = vadd.s32 %v161_v3, %v159_v53 }
  0xa7   :  { %v296_v7 = vsel %vm282_vm11, %v293_v61, %v295_v1  ;;  %v323_v22 = vshrl.u32 %v292_v6, 16  ;;  %v174_v24 = vshll.u32 %v1471_v44, 16  ;;  %v1508_v32 = vsel %vm128_vm4, %v1417_v15, %v1421_v16  ;;  %v1136_v15 = vld [vmem:[#allocation3] sm:$0xff]  ;;  %802 = vmatpush.bf16.msra.mxu0 %v1144_v45 }
  0xa8   :  { %v300_v19 = vand.u32 65535, %v296_v7  ;;  %v301_v21 = vshrl.u32 %v296_v7, 16  ;;  %v322_v37 = vand.u32 65535, %v292_v6  ;;  %v153_v38 = vshrl.u32 %v1413_v12, 16 }
  0xa9   :  { %v170_v39 = vmul.u32 %v168_v23, %v1403_v4  ;;  %v173_v40 = vmul.u32 %v169_v28, %v1424_v18  ;;  %v325_v26 = vmul.u32 %v323_v22, %v1434_v30  ;;  %v155_v12 = vshrl.u32 %v1430_v25, 16  ;;  %864 = vmatpush.bf16.msra.mxu1 %v1136_v15 }
  0xaa   :  { %v303_v42 = vmul.u32 %v301_v21, %v1434_v30  ;;  %v304_v43 = vmul.u32 %v300_v19, %v1437_v31  ;;  %v164_v16 = vadd.s32 %v163_v14, %v153_v38  ;;  %v176_v46 = vshll.u32 %v1497_v5, 16 }
  0xab   :  { %v302_v4 = vmul.u32 %v300_v19, %v1434_v30  ;;  %v305_v8 = vmul.u32 %v301_v21, %v1437_v31  ;;  %vm178_vm12 = vc.u32 %v170_v39, %v174_v24  ;;  %v326_v28 = vmul.u32 %v322_v37, %v1437_v31 }
  0xac   :  { %v306_v18 = vshll.u32 %v303_v42, 16  ;;  %v308_v23 = vshll.u32 %v304_v43, 16  ;;  %v179_v47 = vsel %vm178_vm12, 1, %v1295_v0  ;;  %v180_v48 = vadd.s32 %v174_v24, %v170_v39 }
  0xad   :  { %v181_v50 = vadd.s32 %v179_v47, %v173_v40  ;;  %v328_v25 = vshll.u32 %v325_v26, 16  ;;  %v324_v52 = vmul.u32 %v322_v37, %v1434_v30  ;;  %v175_v29 = vshrl.u32 %v1471_v44, 16 }
  0xae   :  { %vm310_vm13 = vc.u32 %v302_v4, %v306_v18  ;;  %v312_v49 = vadd.s32 %v306_v18, %v302_v4  ;;  %vm182_vm14 = vc.u32 %v180_v48, %v176_v46  ;;  %v327_v33 = vmul.u32 %v323_v22, %v1437_v31 }
  0xaf   :  { %v311_v51 = vsel %vm310_vm13, 1, %v1295_v0  ;;  %v183_v36 = vsel %vm182_vm14, 1, %v1295_v0  ;;  %v165_v58 = vadd.s32 %v164_v16, %v155_v12  ;;  %v307_v59 = vshrl.u32 %v303_v42, 16 }
  0xb0   :  { %v313_v53 = vadd.s32 %v311_v51, %v305_v8  ;;  %vm314_vm15 = vc.u32 %v312_v49, %v308_v23  ;;  %v185_v41 = vadd.s32 %v183_v36, %v181_v50  ;;  %v330_v62 = vshll.u32 %v326_v28, 16 }
  0xb1   :  { %v315_v60 = vsel %vm314_vm15, 1, %v1295_v0  ;;  %vm332_vm0 = vc.u32 %v324_v52, %v328_v25  ;;  %v334_v63 = vadd.s32 %v328_v25, %v324_v52  ;;  %v286_v30 = vsel %vm284_vm8, %v1465_v57, 2102212464 }
  0xb2   :  { %v317_v61 = vadd.s32 %v315_v60, %v313_v53  ;;  %v177_v44 = vshrl.u32 %v1497_v5, 16  ;;  %v186_v1 = vadd.s32 %v185_v41, %v175_v29  ;;  %v333_v31 = vsel %vm332_vm0, 1, %v1295_v0 }
  0xb3   :  { %v184_v2 = vadd.s32 %v180_v48, %v176_v46  ;;  %v335_v6 = vadd.s32 %v333_v31, %v327_v33  ;;  %vm336_vm1 = vc.u32 %v334_v63, %v330_v62  ;;  %v265_v7 = vshrl.u32 %v1296_v27, %v1442_v35 }
  0xb4   :  { %v318_v3 = vadd.s32 %v317_v61, %v307_v59  ;;  %v187_v9 = vadd.s32 %v186_v1, %v177_v44  ;;  %v309_v14 = vshrl.u32 %v304_v43, 16  ;;  %v337_v19 = vsel %vm336_vm1, 1, %v1295_v0 }
  0xb5   :  { %vm190_vm2 = vc.u32 %v165_v58, %v184_v2  ;;  %v329_v21 = vshrl.u32 %v325_v26, 16  ;;  %v339_v22 = vadd.s32 %v337_v19, %v335_v6  ;;  %v285_v57 = vsel %vm281_vm7, %v265_v7, %v1461_v54 }
  0xb6   :  { %v287_v5 = vsel %vm283_vm10, %v1463_v56, %v286_v30  ;;  %v191_v24 = vadd.s32 1, %v187_v9  ;;  %v319_v37 = vadd.s32 %v318_v3, %v309_v14  ;;  %v188_v27 = vmul.u32 %v1385_v55, %v1508_v32 }
  0xb7   :  { %v331_v35 = vshrl.u32 %v326_v28, 16  ;;  %v340_v38 = vadd.s32 %v339_v22, %v329_v21  ;;  %v338_v0 = vadd.s32 %v334_v63, %v330_v62  ;;  %v288_v40 = vsel %vm282_vm11, %v285_v57, %v287_v5 }
  0xb8   :  { %v192_v39 = vsel %vm190_vm2, %v191_v24, %v187_v9  ;;  %v342_v26 = vmul.u32 %v1410_v11, %v288_v40  ;;  %v189_v50 = vadd.s32 %v184_v2, %v165_v58  ;;  %vm97_vm8 = vcmp.lt.s32.totalorder %v1356_v10, 0 }
  0xb9   :  { %v193_v42 = vadd.s32 %v192_v39, %v188_v27  ;;  %v341_v43 = vadd.s32 %v340_v38, %v331_v35  ;;  %vm344_vm3 = vc.u32 %v319_v37, %v338_v0  ;;  %v343_v60 = vadd.s32 %v338_v0, %v319_v37 }
  0xba   :  { %vm1557_vm9 = vcmp.le.f32.partialorder %v95_v13, 0.7853982  ;;  %vm251_vm10 = vcmp.lt.s32.totalorder %v1360_v17, 0  ;;  %vm250_vm11 = vcmp.le.f32.partialorder %v249_v20, 0.7853982 }
  0xbb   :  { %v194_v54 = vadd.s32 536870912, %v193_v42  ;;  %v345_v45 = vadd.s32 1, %v341_v43 }
  0xbd   :  { %v195_v56 = vshrl.u32 %v194_v54, 30  ;;  %v346_v15 = vsel %vm344_vm3, %v345_v45, %v341_v43 }
  0xbe   :  { %v347_v12 = vadd.s32 %v346_v15, %v342_v26 }
  0xbf   :  { %v196_v16 = vshll.u32 %v195_v56, 30  ;;  %v219_v24 = vsub.s32 4, %v195_v56 }
  0xc0   :  { %v348_v46 = vadd.s32 536870912, %v347_v12 }
  0xc1   :  { %v197_v55 = vsub.s32 %v193_v42, %v196_v16  ;;  %v220_v0 = vsel %vm97_vm8, %v219_v24, %v195_v56 }
  0xc2   :  { %v1551_v32 = vshrl.u32 %v348_v46, 30 }
  0xc3   :  { %vm198_vm4 = vcmp.lt.s32.totalorder %v197_v55, 0  ;;  %v199_v4 = vsub.s32 0, %v197_v55 }
  0xc4   :  { %v350_v34 = vshll.u32 %v1551_v32, 30  ;;  %v373_v13 = vsub.s32 4, %v1551_v32 }
  0xc5   :  { %v200_v8 = vsel %vm198_vm4, %v199_v4, %v197_v55 }
  0xc6   :  { %v201_v18 = vclz %v200_v8  ;;  %v351_v23 = vsub.s32 %v347_v12, %v350_v34  ;;  %v374_v15 = vsel %vm251_vm10, %v373_v13, %v1551_v32  ;;  %v222_v12 = vsel %vm1557_vm9, 0, %v220_v0  ;;  %v1157_v13 = vld [vmem:[#allocation8 + $0x28] sm:$0xff] }
  0xc7   :  { %v376_v4 = vsel %vm250_vm11, 0, %v374_v15 }
  0xc8   :  { %v1027_v28 = vadd.s32 4294967294, %v201_v18  ;;  %vm352_vm5 = vcmp.lt.s32.totalorder %v351_v23, 0  ;;  %v353_v47 = vsub.s32 0, %v351_v23 }
  0xca   :  { %vm1028_vm6 = vcmp.lt.s32.totalorder %v1027_v28, 0  ;;  %v354_v11 = vsel %vm352_vm5, %v353_v47, %v351_v23 }
  0xcb   :  { %v204_v48 = vsel %vm1028_vm6, 0, %v1027_v28  ;;  %v355_v49 = vclz %v354_v11 }
  0xcc   :  { %v205_v25 = vsub.s32 32, %v204_v48  ;;  %v209_v51 = vsub.s32 4294967266, %v204_v48  ;;  %v206_v29 = vshll.u32 %v197_v55, %v204_v48  ;;  %v702_v48 = vadd.s32 3, %v376_v4 }
  0xcd   :  { %v1030_v52 = vadd.s32 4294967294, %v355_v49 }
  0xce   :  { %v207_v53 = vshrl.u32 %v189_v50, %v205_v25  ;;  %v210_v33 = vadd.s32 127, %v209_v51  ;;  %v239_v25 = vand.u32 3, %v222_v12 }
  0xcf   :  { %vm1031_vm7 = vcmp.lt.s32.totalorder %v1030_v52, 0 }
  0xd0   :  { %v208_v36 = vor.u32 %v207_v53, %v206_v29  ;;  %v211_v41 = vshll.u32 %v210_v33, 23  ;;  %v358_v59 = vsel %vm1031_vm7, 0, %v1030_v52  ;;  %vm240_vm12 = vcmp.lt.s32.totalorder %v239_v25, 2 }
  0xd1   :  { %v359_v61 = vsub.s32 32, %v358_v59  ;;  %v363_v62 = vsub.s32 4294967266, %v358_v59  ;;  %v360_v30 = vshll.u32 %v351_v23, %v358_v59  ;;  %v547_v23 = vadd.s32 3, %v222_v12 }
  0xd2   :  { %v212_v63 = vor.u32 4788187, %v211_v41  ;;  %v215_v3 = vcvt.s32.f32 %v208_v36  ;;  %v703_v36 = vand.u32 3, %v702_v48  ;;  %v393_v41 = vand.u32 3, %v376_v4 }
  0xd3   :  { %v361_v44 = vshrl.u32 %v343_v60, %v359_v61  ;;  %v364_v1 = vadd.s32 127, %v363_v62  ;;  %v548_v52 = vand.u32 3, %v547_v23  ;;  %vm241_vm15 = vcmp.eq.s32.totalorder %v239_v25, 0 }
  0xd4   :  { %v213_v31 = vand.u32 2147483647, %v212_v63  ;;  %vm244_vm0 = vcmp.eq.s32.totalorder %v239_v25, 2  ;;  %vm704_vm2 = vcmp.lt.s32.totalorder %v703_v36, 2  ;;  %vm394_vm3 = vcmp.lt.s32.totalorder %v393_v41, 2 }
  0xd5   :  { %v362_v58 = vor.u32 %v361_v44, %v360_v30  ;;  %v365_v2 = vshll.u32 %v364_v1, 23  ;;  %vm549_vm13 = vcmp.lt.s32.totalorder %v548_v52, 2  ;;  %vm550_vm14 = vcmp.eq.s32.totalorder %v548_v52, 0 }
  0xd6   :  { %v216_v6 = vmul.f32 %v215_v3, %v213_v31  ;;  %vm553_vm1 = vcmp.eq.s32.totalorder %v548_v52, 2  ;;  %vm395_vm4 = vcmp.eq.s32.totalorder %v393_v41, 0  ;;  %vm705_vm5 = vcmp.eq.s32.totalorder %v703_v36, 0 }
  0xd7   :  { %v366_v7 = vor.u32 4788187, %v365_v2  ;;  %v369_v19 = vcvt.s32.f32 %v362_v58  ;;  %vm708_vm6 = vcmp.eq.s32.totalorder %v703_v36, 2  ;;  %vm398_vm7 = vcmp.eq.s32.totalorder %v393_v41, 2 }
  0xd8   :  { %v217_v9 = vxor.u32 2147483648, %v216_v6 }
  0xd9   :  { %v367_v14 = vand.u32 2147483647, %v366_v7 }
  0xda   :  { %v218_v22 = vsel %vm97_vm8, %v217_v9, %v216_v6  ;;  %vm238_vm8 = vweird.f32 %v1356_v10 }
  0xdb   :  { %v221_v57 = vsel %vm1557_vm9, %v1356_v10, %v218_v22  ;;  %v370_v5 = vmul.f32 %v369_v19, %v367_v14  ;;  %vm392_vm9 = vweird.f32 %v1360_v17  ;;  %v1156_v10 = vld [vmem:[#allocation8 + $0x20] sm:$0xff] }
  0xdc   :  { %v223_v37 = vmul.f32 %v221_v57, %v221_v57 }
  0xdd   :  { %v371_v27 = vxor.u32 2147483648, %v370_v5 }
  0xde   :  { %v224_v35 = vmul.f32 -0.001358992, %v223_v37  ;;  %v231_v38 = vmul.f32 -0.00019511016, %v223_v37 }
  0xdf   :  { %v372_v39 = vsel %vm251_vm10, %v371_v27, %v370_v5 }
  0xe0   :  { %v225_v40 = vadd.f32 0.041655596, %v224_v35  ;;  %v232_v42 = vadd.f32 0.008332121, %v231_v38  ;;  %v375_v43 = vsel %vm250_vm11, %v1360_v17, %v372_v39  ;;  %v1159_v35 = vld [vmem:[#allocation8 + $0x38] sm:$0xff]  ;;  %v1158_v38 = vld [vmem:[#allocation8 + $0x30] sm:$0xff] }
  0xe1   :  { %v377_v54 = vmul.f32 %v375_v43, %v375_v43  ;;  %990 = vmatpush.bf16.msra.mxu2 %v1159_v35  ;;  %v1155_v17 = vld [vmem:[#allocation8 + $0x18] sm:$0xff]  ;;  %v1176_v39 = vld [vmem:[%s1594_s3] ss:$0 sm:$0xff] }
  0xe2   :  { %v226_v45 = vmul.f32 %v225_v40, %v223_v37  ;;  %v233_v26 = vmul.f32 %v232_v42, %v223_v37 }
  0xe3   :  { %v378_v16 = vmul.f32 -0.001358992, %v377_v54  ;;  %v385_v46 = vmul.f32 -0.00019511016, %v377_v54 }
  0xe4   :  { %v227_v55 = vadd.f32 -0.4999988, %v226_v45  ;;  %v234_v20 = vadd.f32 -0.16666654, %v233_v26  ;;  %v1153_v26 = vld [vmem:[#allocation8 + $0x8] sm:$0xff] }
  0xe5   :  { %v379_v34 = vadd.f32 0.041655596, %v378_v16  ;;  %v386_v8 = vadd.f32 0.008332121, %v385_v46  ;;  %991 = vmatpush.bf16.msra.mxu2 %v1158_v38  ;;  %v1152_v46 = vld [vmem:[#allocation8] sm:$0xff] }
  0xe6   :  { %v228_v56 = vmul.f32 %v227_v55, %v223_v37  ;;  %v235_v18 = vmul.f32 %v234_v20, %v223_v37 }
  0xe7   :  { %v380_v28 = vmul.f32 %v379_v34, %v377_v54  ;;  %v387_v47 = vmul.f32 %v386_v8, %v377_v54 }
  0xe8   :  { %v236_v11 = vadd.f32 1.0, %v235_v18  ;;  %v229_v49 = vadd.f32 1.0, %v228_v56 }
  0xe9   :  { %v381_v50 = vadd.f32 -0.4999988, %v380_v28  ;;  %v388_v32 = vadd.f32 -0.16666654, %v387_v47  ;;  %992 = vmatpush.bf16.msra.mxu2 %v1157_v13 }
  0xea   :  { %v237_v51 = vmul.f32 %v236_v11, %v221_v57  ;;  %v245_v59 = vxor.u32 2147483648, %v229_v49 }
  0xeb   :  { %v382_v29 = vmul.f32 %v381_v50, %v377_v54  ;;  %v389_v53 = vmul.f32 %v388_v32, %v377_v54 }
  0xec   :  { %v242_v33 = vxor.u32 2147483648, %v237_v51  ;;  %v555_v31 = vsel %vm553_vm1, %v245_v59, %v237_v51  ;;  %v246_v3 = vsel %vm244_vm0, %v245_v59, %v237_v51 }
  0xed   :  { %v383_v60 = vadd.f32 1.0, %v382_v29  ;;  %v390_v61 = vadd.f32 1.0, %v389_v53  ;;  %993 = vmatpush.bf16.msra.mxu2 %v1156_v10 }
  0xee   :  { %v552_v30 = vsel %vm550_vm14, %v229_v49, %v242_v33  ;;  %v243_v44 = vsel %vm241_vm15, %v229_v49, %v242_v33 }
  0xef   :  { %v391_v62 = vmul.f32 %v390_v61, %v375_v43  ;;  %v399_v63 = vxor.u32 2147483648, %v383_v60  ;;  %v556_v58 = vsel %vm549_vm13, %v552_v30, %v555_v31  ;;  %v247_v2 = vsel %vm240_vm12, %v243_v44, %v246_v3  ;;  %v1154_v43 = vld [vmem:[#allocation8 + $0x10] sm:$0xff]  ;;  %v1177_v44 = vld [vmem:[%s1596_s5] ss:$0 sm:$0xff] }
  0xf0   :  { %v557_v22 = vsel %vm238_vm8, nan, %v556_v58  ;;  %v248_v5 = vsel %vm238_vm8, nan, %v247_v2 }
  0xf1   :  { %v396_v1 = vxor.u32 2147483648, %v391_v62  ;;  %v710_v7 = vsel %vm708_vm6, %v399_v63, %v391_v62  ;;  %v400_v14 = vsel %vm398_vm7, %v399_v63, %v391_v62  ;;  %994 = vmatpush.bf16.msra.mxu2 %v1155_v17 }
  0xf3   :  { %v707_v6 = vsel %vm705_vm5, %v383_v60, %v396_v1  ;;  %v397_v9 = vsel %vm395_vm4, %v383_v60, %v396_v1 }
  0xf4   :  { %v711_v19 = vsel %vm704_vm2, %v707_v6, %v710_v7  ;;  %v401_v21 = vsel %vm394_vm3, %v397_v9, %v400_v14 }
  0xf5   :  { %v712_v57 = vsel %vm392_vm9, nan, %v711_v19  ;;  %v402_v24 = vsel %vm392_vm9, nan, %v401_v21  ;;  %995 = vmatpush.bf16.msra.mxu2 %v1154_v43 }
  0xf6   :  { %v730_v37 = vpack.c.bf16 %v712_v57, %v557_v22  ;;  %v713_v27 = vpack.c.bf16 %v402_v24, %v248_v5 }
  0xf8   :  { %803 = vmatmul.bf16.vlgmr.msra.gmra.mxu0 %v730_v37  ;;  %865 = vmatmul.bf16.vlgmr.msra.gmra.mxu1 %v713_v27 }
  0xf9   :  { %996 = vmatpush.bf16.msra.mxu2 %v1153_v26 }
  0xfd   :  { %997 = vmatpush.bf16.msra.mxu2 %v1152_v46 }
 0x175   :  { %v804_v0 = vpop.f32.mrf.mxu0  ;;  %v866_v40 = vpop.f32.mrf.mxu1 }
 0x176   :  { %v867_v42 = vadd.f32 %v866_v40, %v804_v0 }
 0x178   :  { %v875_v54 = vadd.f32 %v1176_v39, %v867_v42 }
 0x17a   :  { %v1102_v45 = vmul.f32 -1.442695, %v875_v54 }
 0x17c   :  { %1180 = vpow2.f32 %v1102_v45 }
 0x17d   :  { %v806_v15 = vpop.f32.mrf.mxu0  ;;  %v868_v12 = vpop.f32.mrf.mxu1 }
 0x17e   :  { %v869_v16 = vadd.f32 %v868_v12, %v806_v15 }
 0x180   :  { %v876_v55 = vadd.f32 %v1176_v39, %v869_v16 }
 0x182   :  { %v1181_v20 = vpop.eup %1180  ;;  %v1103_v4 = vmul.f32 -1.442695, %v876_v55 }
 0x183   :  { %v883_v34 = vadd.f32 1.0, %v1181_v20 }
 0x184   :  { %1182 = vpow2.f32 %v1103_v4 }
 0x185   :  { %1184 = vrcp.f32 %v883_v34  ;;  %v896_v50 = vand.u32 2147483648, %v883_v34  ;;  %vm890_vm11 = vweird.f32 %v883_v34  ;;  %v894_v32 = vand.u32 2147483647, %v883_v34 }
 0x187   :  { %v897_v33 = vor.u32 1.1754944e-38, %v896_v50  ;;  %vm895_vm14 = vcmp.eq.f32.partialorder %v894_v32, 8.507059e+37 }
 0x18a   :  { %v1183_v8 = vpop.eup %1182 }
 0x18b   :  { %v1185_v56 = vpop.eup %1184  ;;  %v884_v18 = vadd.f32 1.0, %v1183_v8 }
 0x18c   :  { %v886_v23 = vmul.f32 %v1185_v56, %v883_v34  ;;  %vm891_vm10 = vweird.f32 %v1185_v56 }
 0x18d   :  { %1186 = vrcp.f32 %v884_v18  ;;  %vm892_vm12 = vmor %vm890_vm11, %vm891_vm10  ;;  %v911_v51 = vand.u32 2147483648, %v884_v18  ;;  %v909_v53 = vand.u32 2147483647, %v884_v18  ;;  %vm905_vm15 = vweird.f32 %v884_v18 }
 0x18e   :  { %v887_v28 = vsub.f32 1.0, %v886_v23 }
 0x18f   :  { %v912_v59 = vor.u32 1.1754944e-38, %v911_v51  ;;  %vm910_vm1 = vcmp.eq.f32.partialorder %v909_v53, 8.507059e+37 }
 0x190   :  { %v888_v47 = vmul.f32 %v1185_v56, %v887_v28 }
 0x192   :  { %v889_v48 = vadd.f32 %v1185_v56, %v888_v47 }
 0x193   :  { %v1187_v11 = vpop.eup %1186 }
 0x194   :  { %v901_v49 = vmul.f32 %v1187_v11, %v884_v18  ;;  %v893_v52 = vsel %vm892_vm12, %v1185_v56, %v889_v48  ;;  %vm906_vm13 = vweird.f32 %v1187_v11 }
 0x195   :  { %v898_v41 = vsel %vm895_vm14, %v897_v33, %v893_v52  ;;  %vm907_vm0 = vmor %vm905_vm15, %vm906_vm13 }
 0x196   :  { %v902_v25 = vsub.f32 1.0, %v901_v49  ;;  %v915_v62 = vmul.f32 %v898_v41, %v875_v54 }
 0x198   :  { %v903_v29 = vmul.f32 %v1187_v11, %v902_v25 }
 0x19a   :  { %v904_v36 = vadd.f32 %v1187_v11, %v903_v29 }
 0x19c   :  { %v908_v60 = vsel %vm907_vm0, %v1187_v11, %v904_v36 }
 0x19d   :  { %v913_v61 = vsel %vm910_vm1, %v912_v59, %v908_v60 }
 0x19e   :  { %v916_v63 = vmul.f32 %v913_v61, %v876_v55 }
 0x1a0   :  { %v921_v30 = vpack.c.bf16 %v916_v63, %v915_v62 }
 0x1a2   :  { %998 = vmatmul.bf16.vlgmr.msra.gmra.mxu2 %v921_v30 }
 0x225   :  { %v999_v1 = vpop.f32.mrf.mxu2 }
 0x226   :  { %v1000_v31 = vadd.f32 %v1177_v44, %v999_v1 }
 0x228   :  { %1004 = vst [vmem:[#allocation9] sm:$0xff] %v1000_v31 }
 0x22d   :  { %v1001_v3 = vpop.f32.mrf.mxu2 }
 0x22e   :  { %v1002_v58 = vadd.f32 %v1177_v44, %v1001_v3 }
 0x230   :  { %1005 = vst [vmem:[#allocation9 + $0x8] sm:$0xff] %v1002_v58 }
 0x231   :  { %1018 = dma.vmem_to_hbm [thread:$0]  %s1011_s18, 256, %s1013_s21, [#allocation5], %s1303_s22, %s1303_s22, %s1304_s23  }
 0x232   :  { %1288 = dma.done.wait [#allocation5], 256  }
 0x233   :  { %1289 = vsyncadd [#allocation5], 4294967040 }
 0x234   :  { %1023 = vsyncpa [#allocation4], 1 }
 0x235   :  { %1024 = vsyncpa [#allocation7], 1 }
 0x236   :  { %1025 = vsyncpa [#allocation5], 1 }

// kernel: tpu_custom_call.1
= control target key start
LH: loop header
LB: loop body
LE: loop exit
PB: predicated region body
PF: predicated region fallthrough
CT: control target
= control target key end

     0   :  { %11 = vsyncpa [#allocation4], 0  ;;  %s1591_s0 = inlined_call_operand.vmem [shape: f32[16,1], index: 0, kind: input, shape index: {}]   ;;  %s1592_s1 = inlined_call_operand.hbm [shape: bf16[128,128], index: 1, kind: input, shape index: {}]   ;;  %s1593_s2 = inlined_call_operand.hbm [shape: bf16[128,128], index: 2, kind: input, shape index: {}]   ;;  %s1594_s3 = inlined_call_operand.vmem [shape: f32[1,128], index: 3, kind: input, shape index: {}]   ;;  %s1595_s4 = inlined_call_operand.hbm [shape: bf16[128,128], index: 4, kind: input, shape index: {}]   ;;  %s1596_s5 = inlined_call_operand.vmem [shape: f32[1,128], index: 5, kind: input, shape index: {}]   ;;  %s1597_s6 = inlined_call_operand.hbm [shape: f32[16,128], index: 6, kind: output, shape index: {}]  }
   0x1   :  { %12 = vsyncpa [#allocation7], 0 }
   0x2   :  { %13 = vsyncpa [#allocation5], 0  ;;  %s33_s23 = sshll.u32 %s1593_s2, 4  ;;  %s1290_s24 = smov [#allocation6]   ;;  %s34_s23 = int_to_ptr.hbm [resolvable:$true] %s33_s23 }
   0x3   :  { %s35_s25 = sshll.u32 %s1290_s24, 4  ;;  %s20_s28 = sshll.u32 %s1592_s1, 4  ;;  %s36_s25 = int_to_ptr.vmem [resolvable:$true] %s35_s25  ;;  %s21_s28 = int_to_ptr.hbm [resolvable:$true] %s20_s28 }
   0x4   :  { %s1291_s29 = smov 64   ;;  %s1292_s30 = smov 4  }
   0x5   :  { %41 = dma.hbm_to_vmem [thread:$0]  %s34_s23, 1024, %s36_s25, [#allocation7], %s1291_s29, %s1291_s29, %s1292_s30  }
   0x6   :  { %s1293_s7 = smov [#allocation3]   ;;  %s48_s11 = sshll.u32 %s1595_s4, 4  ;;  %s49_s11 = int_to_ptr.hbm [resolvable:$true] %s48_s11 }
   0x7   :  { %s22_s8 = sshll.u32 %s1293_s7, 4  ;;  %s1294_s2 = smov [#allocation8]   ;;  %s23_s8 = int_to_ptr.vmem [resolvable:$true] %s22_s8 }
   0x8   :  { %28 = dma.hbm_to_vmem [thread:$0]  %s21_s28, 1024, %s23_s8, [#allocation4], %s1291_s29, %s1291_s29, %s1292_s30  }
   0x9   :  { %s50_s12 = sshll.u32 %s1294_s2, 4  ;;  %s51_s12 = int_to_ptr.vmem [resolvable:$true] %s50_s12 }
   0xa   :  { %56 = dma.hbm_to_vmem [thread:$0]  %s49_s11, 1024, %s51_s12, [#allocation7], %s1291_s29, %s1291_s29, %s1292_s30  }
   0xb   :  { %1284 = dma.done.wait [#allocation4], 1024  }
   0xc   :  { %1285 = vsyncadd [#allocation4], 4294966272 }
   0xd   :  { %1286 = dma.done.wait [#allocation7], 2048  }
   0xe   :  { %1287 = vsyncadd [#allocation7], 4294965248  ;;  %v1295_v0 = vmov 0   ;;  %v81_v1 = vld [vmem:[%s1591_s0] sm:$0xff]  ;;  %v82_v2 = vld [vmem:[%s1591_s0 + $0x8] sm:$0xff]  ;;  %v75_v3 = vlaneseq  ;;  %s1302_s17 = smov [#allocation9]  }
   0xf   :  { %1175 = vset.pattern.permute.xlu0 %v1295_v0  ;;  %v1296_v27 = vmov 683565275   ;;  %v1297_v29 = vmov 2475754826   ;;  %v1298_v33 = vmov 2131351028  }
  0x10   :  { %85 = vperm.xlu0 %1175, %v81_v1   ;;  %v76_v4 = vand.u32 127, %v75_v3  ;;  %v1299_v36 = vmov 2102212464   ;;  %v1151_v38 = vld [vmem:[#allocation6 + $0x38] sm:$0xff]  ;;  %v1300_v41 = vmov 920167782  }
  0x11   :  { %v1143_v39 = vld [vmem:[#allocation3 + $0x38] sm:$0xff]  ;;  %v1301_v44 = vmov 1326507024   ;;  %795 = vmatpush.bf16.msra.mxu0 %v1151_v38  ;;  %v1150_v50 = vld [vmem:[#allocation6 + $0x30] sm:$0xff]  ;;  %v1149_v63 = vld [vmem:[#allocation6 + $0x28] sm:$0xff]  ;;  %s1010_s18 = sshll.u32 %s1302_s17, 4  ;;  %s1011_s18 = int_to_ptr.vmem [resolvable:$true] %s1010_s18 }
  0x12   :  { %v77_v5 = vcvt.s32.f32 %v76_v4  ;;  %857 = vmatpush.bf16.msra.mxu1 %v1143_v39  ;;  %v1142_v51 = vld [vmem:[#allocation3 + $0x30] sm:$0xff]  ;;  %s1012_s21 = sshll.u32 %s1597_s6, 4  ;;  %s1303_s22 = smov 128   ;;  %s1013_s21 = int_to_ptr.hbm [resolvable:$true] %s1012_s21 }
  0x13   :  { %s1304_s23 = smov 8  }
  0x14   :  { %v78_v6 = vmul.f32 -0.071955785, %v77_v5 }
  0x15   :  { %796 = vmatpush.bf16.msra.mxu0 %v1150_v50 }
  0x16   :  { %v79_v7 = vmul.f32 1.442695, %v78_v6  ;;  %858 = vmatpush.bf16.msra.mxu1 %v1142_v51 }
  0x18   :  { %90 = vperm.xlu0 %1175, %v82_v2   ;;  %1178 = vpow2.f32 %v79_v7  ;;  %v1141_v2 = vld [vmem:[#allocation3 + $0x28] sm:$0xff] }
  0x19   :  { %797 = vmatpush.bf16.msra.mxu0 %v1149_v63 }
  0x1a   :  { %859 = vmatpush.bf16.msra.mxu1 %v1141_v2  ;;  %v1145_v2 = vld [vmem:[#allocation6 + $0x8] sm:$0xff] }
  0x1e   :  { %v1179_v8 = vpop.eup %1178 }
  0x82   :  { %v86_v9 = vpop.permute.xlu0 %85 }
  0x83   :  { %v1356_v10 = vmul.f32 %v1179_v8, %v86_v9 }
  0x85   :  { %v98_v11 = vand.u32 2139095040, %v1356_v10  ;;  %v95_v13 = vand.u32 2147483647, %v1356_v10 }
  0x87   :  { %v99_v12 = vshrl.u32 %v98_v11, 23  ;;  %v102_v18 = vand.u32 8388607, %v95_v13 }
  0x89   :  { %v1026_v14 = vadd.s32 4294967169, %v99_v12  ;;  %v103_v23 = vor.u32 8388608, %v102_v18 }
  0x8a   :  { %v91_v15 = vpop.permute.xlu0 %90 }
  0x8b   :  { %v105_v16 = vadd.s32 1, %v1026_v14  ;;  %v1360_v17 = vmul.f32 %v1179_v8, %v91_v15  ;;  %v1385_v55 = vshll.u32 %v103_v23, 8  ;;  %v1148_v14 = vld [vmem:[#allocation6 + $0x20] sm:$0xff] }
  0x8c   :  { %798 = vmatpush.bf16.msra.mxu0 %v1148_v14 }
  0x8d   :  { %vm106_vm0 = vcmp.gt.s32.totalorder %v105_v16, 0  ;;  %v249_v20 = vand.u32 2147483647, %v1360_v17  ;;  %v252_v21 = vand.u32 2139095040, %v1360_v17  ;;  %v1403_v4 = vand.u32 65535, %v1385_v55 }
  0x8e   :  { %v107_v19 = vsel %vm106_vm0, %v105_v16, 0  ;;  %v1424_v18 = vshrl.u32 %v1385_v55, 16 }
  0x8f   :  { %v109_v22 = vand.u32 31, %v107_v19  ;;  %v253_v25 = vshrl.u32 %v252_v21, 23  ;;  %v1366_v26 = vshrl.u32 %v107_v19, 5  ;;  %v256_v31 = vand.u32 8388607, %v249_v20  ;;  %v1140_v19 = vld [vmem:[#allocation3 + $0x20] sm:$0xff] }
  0x90   :  { %860 = vmatpush.bf16.msra.mxu1 %v1140_v19 }
  0x91   :  { %v110_v24 = vsub.s32 32, %v109_v22  ;;  %v112_v28 = vshll.u32 %v1296_v27, %v109_v22  ;;  %v115_v30 = vshll.u32 %v1297_v29, %v109_v22  ;;  %v118_v35 = vshll.u32 %v1298_v33, %v109_v22 }
  0x92   :  { %v121_v40 = vshll.u32 %v1299_v36, %v109_v22  ;;  %v124_v43 = vshll.u32 %v1300_v41, %v109_v22  ;;  %v1029_v49 = vadd.s32 4294967169, %v253_v25  ;;  %vm127_vm1 = vcmp.lt.s32.totalorder %v1366_v26, 1 }
  0x93   :  { %v113_v32 = vshrl.u32 %v1297_v29, %v110_v24  ;;  %v116_v34 = vshrl.u32 %v1298_v33, %v110_v24  ;;  %v119_v37 = vshrl.u32 %v1299_v36, %v110_v24  ;;  %v122_v42 = vshrl.u32 %v1300_v41, %v110_v24 }
  0x94   :  { %v125_v45 = vshrl.u32 %v1301_v44, %v110_v24  ;;  %vm129_vm2 = vcmp.lt.s32.totalorder %v1366_v26, 3  ;;  %vm130_vm3 = vcmp.lt.s32.totalorder %v1366_v26, 4  ;;  %v257_v58 = vor.u32 8388608, %v256_v31 }
  0x95   :  { %v114_v46 = vor.u32 %v113_v32, %v112_v28  ;;  %v117_v47 = vor.u32 %v116_v34, %v115_v30  ;;  %v120_v48 = vor.u32 %v119_v37, %v118_v35  ;;  %v123_v52 = vor.u32 %v122_v42, %v121_v40  ;;  %v1147_v37 = vld [vmem:[#allocation6 + $0x18] sm:$0xff] }
  0x96   :  { %v126_v53 = vor.u32 %v125_v45, %v124_v43  ;;  %v259_v59 = vadd.s32 1, %v1029_v49  ;;  %vm128_vm4 = vcmp.lt.s32.totalorder %v1366_v26, 2  ;;  %v111_v7 = vshrl.u32 %v1296_v27, %v110_v24  ;;  %v1139_v43 = vld [vmem:[#allocation3 + $0x18] sm:$0xff]  ;;  %799 = vmatpush.bf16.msra.mxu0 %v1147_v37 }
  0x97   :  { %v139_v54 = vsel %vm127_vm1, %v117_v47, %v120_v48  ;;  %v136_v56 = vsel %vm130_vm3, %v123_v52, 920167782  ;;  %v135_v60 = vsel %vm127_vm1, %v114_v46, %v117_v47  ;;  %v132_v3 = vsel %vm130_vm3, %v120_v48, 2102212464  ;;  %861 = vmatpush.bf16.msra.mxu1 %v1139_v43 }
  0x98   :  { %v140_v57 = vsel %vm130_vm3, %v126_v53, 1326507024  ;;  %v137_v61 = vsel %vm129_vm2, %v120_v48, %v136_v56  ;;  %vm260_vm5 = vcmp.gt.s32.totalorder %v259_v59, 0  ;;  %v1410_v11 = vshll.u32 %v257_v58, 8 }
  0x99   :  { %v141_v62 = vsel %vm129_vm2, %v123_v52, %v140_v57  ;;  %v1408_v8 = vsel %vm128_vm4, %v135_v60, %v137_v61  ;;  %v261_v9 = vsel %vm260_vm5, %v259_v59, 0  ;;  %v1417_v15 = vsel %vm127_vm1, %v111_v7, %v114_v46 }
  0x9a   :  { %v142_v1 = vsel %vm128_vm4, %v139_v54, %v141_v62  ;;  %v1421_v16 = vsel %vm129_vm2, %v117_v47, %v132_v3  ;;  %v168_v23 = vand.u32 65535, %v1408_v8  ;;  %v263_v24 = vand.u32 31, %v261_v9 }
  0x9b   :  { %v146_v5 = vand.u32 65535, %v142_v1  ;;  %v147_v6 = vshrl.u32 %v142_v1, 16  ;;  %v169_v28 = vshrl.u32 %v1408_v8, 16  ;;  %v1434_v30 = vand.u32 65535, %v1410_v11 }
  0x9c   :  { %v1437_v31 = vshrl.u32 %v1410_v11, 16  ;;  %v1440_v34 = vshrl.u32 %v261_v9, 5  ;;  %v1442_v35 = vsub.s32 32, %v263_v24  ;;  %v266_v40 = vshll.u32 %v1296_v27, %v263_v24  ;;  %v1137_v9 = vld [vmem:[#allocation3 + $0x8] sm:$0xff] }
  0x9d   :  { %v1413_v12 = vmul.u32 %v147_v6, %v1403_v4  ;;  %v148_v21 = vmul.u32 %v146_v5, %v1403_v4  ;;  %v1430_v25 = vmul.u32 %v146_v5, %v1424_v18  ;;  %v151_v32 = vmul.u32 %v147_v6, %v1424_v18 }
  0x9e   :  { %v269_v42 = vshll.u32 %v1297_v29, %v263_v24  ;;  %v267_v45 = vshrl.u32 %v1297_v29, %v1442_v35  ;;  %v270_v46 = vshrl.u32 %v1298_v33, %v1442_v35  ;;  %v272_v47 = vshll.u32 %v1298_v33, %v263_v24  ;;  %v1146_v33 = vld [vmem:[#allocation6 + $0x10] sm:$0xff] }
  0x9f   :  { %v152_v22 = vshll.u32 %v1413_v12, 16  ;;  %v275_v48 = vshll.u32 %v1299_v36, %v263_v24  ;;  %v273_v49 = vshrl.u32 %v1299_v36, %v1442_v35  ;;  %v276_v50 = vshrl.u32 %v1300_v41, %v1442_v35  ;;  %800 = vmatpush.bf16.msra.mxu0 %v1146_v33 }
  0xa0   :  { %v278_v51 = vshll.u32 %v1300_v41, %v263_v24  ;;  %v279_v52 = vshrl.u32 %v1301_v44, %v1442_v35  ;;  %v154_v29 = vshll.u32 %v1430_v25, 16  ;;  %v1461_v54 = vor.u32 %v267_v45, %v266_v40  ;;  %v1138_v41 = vld [vmem:[#allocation3 + $0x10] sm:$0xff]  ;;  %v1144_v45 = vld [vmem:[#allocation6] sm:$0xff] }
  0xa1   :  { %vm156_vm6 = vc.u32 %v148_v21, %v152_v22  ;;  %v158_v39 = vadd.s32 %v152_v22, %v148_v21  ;;  %v1463_v56 = vor.u32 %v270_v46, %v269_v42  ;;  %v1465_v57 = vor.u32 %v273_v49, %v272_v47  ;;  %862 = vmatpush.bf16.msra.mxu1 %v1138_v41 }
  0xa2   :  { %v157_v38 = vsel %vm156_vm6, 1, %v1295_v0  ;;  %v277_v36 = vor.u32 %v276_v50, %v275_v48  ;;  %v280_v58 = vor.u32 %v279_v52, %v278_v51  ;;  %vm281_vm7 = vcmp.lt.s32.totalorder %v1440_v34, 1 }
  0xa3   :  { %v159_v53 = vadd.s32 %v157_v38, %v151_v32  ;;  %v1471_v44 = vmul.u32 %v169_v28, %v1403_v4  ;;  %vm284_vm8 = vcmp.lt.s32.totalorder %v1440_v34, 4  ;;  %v289_v59 = vsel %vm281_vm7, %v1461_v54, %v1463_v56  ;;  %801 = vmatpush.bf16.msra.mxu0 %v1145_v2 }
  0xa4   :  { %vm160_vm9 = vc.u32 %v158_v39, %v154_v29  ;;  %vm283_vm10 = vcmp.lt.s32.totalorder %v1440_v34, 3  ;;  %v290_v60 = vsel %vm284_vm8, %v277_v36, 920167782  ;;  %v293_v61 = vsel %vm281_vm7, %v1463_v56, %v1465_v57 }
  0xa5   :  { %v294_v62 = vsel %vm284_vm8, %v280_v58, 1326507024  ;;  %vm282_vm11 = vcmp.lt.s32.totalorder %v1440_v34, 2  ;;  %v291_v63 = vsel %vm283_vm10, %v1465_v57, %v290_v60  ;;  %v161_v3 = vsel %vm160_vm9, 1, %v1295_v0  ;;  %863 = vmatpush.bf16.msra.mxu1 %v1137_v9 }
  0xa6   :  { %v295_v1 = vsel %vm283_vm10, %v277_v36, %v294_v62  ;;  %v1497_v5 = vmul.u32 %v168_v23, %v1424_v18  ;;  %v292_v6 = vsel %vm282_vm11, %v289_v59, %v291_v63  ;;  %v163_v14 = vadd.s32 %v161_v3, %v159_v53 }
  0xa7   :  { %v296_v7 = vsel %vm282_vm11, %v293_v61, %v295_v1  ;;  %v323_v22 = vshrl.u32 %v292_v6, 16  ;;  %v174_v24 = vshll.u32 %v1471_v44, 16  ;;  %v1508_v32 = vsel %vm128_vm4, %v1417_v15, %v1421_v16  ;;  %v1136_v15 = vld [vmem:[#allocation3] sm:$0xff]  ;;  %802 = vmatpush.bf16.msra.mxu0 %v1144_v45 }
  0xa8   :  { %v300_v19 = vand.u32 65535, %v296_v7  ;;  %v301_v21 = vshrl.u32 %v296_v7, 16  ;;  %v322_v37 = vand.u32 65535, %v292_v6  ;;  %v153_v38 = vshrl.u32 %v1413_v12, 16 }
  0xa9   :  { %v170_v39 = vmul.u32 %v168_v23, %v1403_v4  ;;  %v173_v40 = vmul.u32 %v169_v28, %v1424_v18  ;;  %v325_v26 = vmul.u32 %v323_v22, %v1434_v30  ;;  %v155_v12 = vshrl.u32 %v1430_v25, 16  ;;  %864 = vmatpush.bf16.msra.mxu1 %v1136_v15 }
  0xaa   :  { %v303_v42 = vmul.u32 %v301_v21, %v1434_v30  ;;  %v304_v43 = vmul.u32 %v300_v19, %v1437_v31  ;;  %v164_v16 = vadd.s32 %v163_v14, %v153_v38  ;;  %v176_v46 = vshll.u32 %v1497_v5, 16 }
  0xab   :  { %v302_v4 = vmul.u32 %v300_v19, %v1434_v30  ;;  %v305_v8 = vmul.u32 %v301_v21, %v1437_v31  ;;  %vm178_vm12 = vc.u32 %v170_v39, %v174_v24  ;;  %v326_v28 = vmul.u32 %v322_v37, %v1437_v31 }
  0xac   :  { %v306_v18 = vshll.u32 %v303_v42, 16  ;;  %v308_v23 = vshll.u32 %v304_v43, 16  ;;  %v179_v47 = vsel %vm178_vm12, 1, %v1295_v0  ;;  %v180_v48 = vadd.s32 %v174_v24, %v170_v39 }
  0xad   :  { %v181_v50 = vadd.s32 %v179_v47, %v173_v40  ;;  %v328_v25 = vshll.u32 %v325_v26, 16  ;;  %v324_v52 = vmul.u32 %v322_v37, %v1434_v30  ;;  %v175_v29 = vshrl.u32 %v1471_v44, 16 }
  0xae   :  { %vm310_vm13 = vc.u32 %v302_v4, %v306_v18  ;;  %v312_v49 = vadd.s32 %v306_v18, %v302_v4  ;;  %vm182_vm14 = vc.u32 %v180_v48, %v176_v46  ;;  %v327_v33 = vmul.u32 %v323_v22, %v1437_v31 }
  0xaf   :  { %v311_v51 = vsel %vm310_vm13, 1, %v1295_v0  ;;  %v183_v36 = vsel %vm182_vm14, 1, %v1295_v0  ;;  %v165_v58 = vadd.s32 %v164_v16, %v155_v12  ;;  %v307_v59 = vshrl.u32 %v303_v42, 16 }
  0xb0   :  { %v313_v53 = vadd.s32 %v311_v51, %v305_v8  ;;  %vm314_vm15 = vc.u32 %v312_v49, %v308_v23  ;;  %v185_v41 = vadd.s32 %v183_v36, %v181_v50  ;;  %v330_v62 = vshll.u32 %v326_v28, 16 }
  0xb1   :  { %v315_v60 = vsel %vm314_vm15, 1, %v1295_v0  ;;  %vm332_vm0 = vc.u32 %v324_v52, %v328_v25  ;;  %v334_v63 = vadd.s32 %v328_v25, %v324_v52  ;;  %v286_v30 = vsel %vm284_vm8, %v1465_v57, 2102212464 }
  0xb2   :  { %v317_v61 = vadd.s32 %v315_v60, %v313_v53  ;;  %v177_v44 = vshrl.u32 %v1497_v5, 16  ;;  %v186_v1 = vadd.s32 %v185_v41, %v175_v29  ;;  %v333_v31 = vsel %vm332_vm0, 1, %v1295_v0 }
  0xb3   :  { %v184_v2 = vadd.s32 %v180_v48, %v176_v46  ;;  %v335_v6 = vadd.s32 %v333_v31, %v327_v33  ;;  %vm336_vm1 = vc.u32 %v334_v63, %v330_v62  ;;  %v265_v7 = vshrl.u32 %v1296_v27, %v1442_v35 }
  0xb4   :  { %v318_v3 = vadd.s32 %v317_v61, %v307_v59  ;;  %v187_v9 = vadd.s32 %v186_v1, %v177_v44  ;;  %v309_v14 = vshrl.u32 %v304_v43, 16  ;;  %v337_v19 = vsel %vm336_vm1, 1, %v1295_v0 }
  0xb5   :  { %vm190_vm2 = vc.u32 %v165_v58, %v184_v2  ;;  %v329_v21 = vshrl.u32 %v325_v26, 16  ;;  %v339_v22 = vadd.s32 %v337_v19, %v335_v6  ;;  %v285_v57 = vsel %vm281_vm7, %v265_v7, %v1461_v54 }
  0xb6   :  { %v287_v5 = vsel %vm283_vm10, %v1463_v56, %v286_v30  ;;  %v191_v24 = vadd.s32 1, %v187_v9  ;;  %v319_v37 = vadd.s32 %v318_v3, %v309_v14  ;;  %v188_v27 = vmul.u32 %v1385_v55, %v1508_v32 }
  0xb7   :  { %v331_v35 = vshrl.u32 %v326_v28, 16  ;;  %v340_v38 = vadd.s32 %v339_v22, %v329_v21  ;;  %v338_v0 = vadd.s32 %v334_v63, %v330_v62  ;;  %v288_v40 = vsel %vm282_vm11, %v285_v57, %v287_v5 }
  0xb8   :  { %v192_v39 = vsel %vm190_vm2, %v191_v24, %v187_v9  ;;  %v342_v26 = vmul.u32 %v1410_v11, %v288_v40  ;;  %v189_v50 = vadd.s32 %v184_v2, %v165_v58  ;;  %vm97_vm8 = vcmp.lt.s32.totalorder %v1356_v10, 0 }
  0xb9   :  { %v193_v42 = vadd.s32 %v192_v39, %v188_v27  ;;  %v341_v43 = vadd.s32 %v340_v38, %v331_v35  ;;  %vm344_vm3 = vc.u32 %v319_v37, %v338_v0  ;;  %v343_v60 = vadd.s32 %v338_v0, %v319_v37 }
  0xba   :  { %vm1557_vm9 = vcmp.le.f32.partialorder %v95_v13, 0.7853982  ;;  %vm251_vm10 = vcmp.lt.s32.totalorder %v1360_v17, 0  ;;  %vm250_vm11 = vcmp.le.f32.partialorder %v249_v20, 0.7853982 }
  0xbb   :  { %v194_v54 = vadd.s32 536870912, %v193_v42  ;;  %v345_v45 = vadd.s32 1, %v341_v43 }
  0xbd   :  { %v195_v56 = vshrl.u32 %v194_v54, 30  ;;  %v346_v15 = vsel %vm344_vm3, %v345_v45, %v341_v43 }
  0xbe   :  { %v347_v12 = vadd.s32 %v346_v15, %v342_v26 }
  0xbf   :  { %v196_v16 = vshll.u32 %v195_v56, 30  ;;  %v219_v24 = vsub.s32 4, %v195_v56 }
  0xc0   :  { %v348_v46 = vadd.s32 536870912, %v347_v12 }
  0xc1   :  { %v197_v55 = vsub.s32 %v193_v42, %v196_v16  ;;  %v220_v0 = vsel %vm97_vm8, %v219_v24, %v195_v56 }
  0xc2   :  { %v1551_v32 = vshrl.u32 %v348_v46, 30 }
  0xc3   :  { %vm198_vm4 = vcmp.lt.s32.totalorder %v197_v55, 0  ;;  %v199_v4 = vsub.s32 0, %v197_v55 }
  0xc4   :  { %v350_v34 = vshll.u32 %v1551_v32, 30  ;;  %v373_v13 = vsub.s32 4, %v1551_v32 }
  0xc5   :  { %v200_v8 = vsel %vm198_vm4, %v199_v4, %v197_v55 }
  0xc6   :  { %v201_v18 = vclz %v200_v8  ;;  %v351_v23 = vsub.s32 %v347_v12, %v350_v34  ;;  %v374_v15 = vsel %vm251_vm10, %v373_v13, %v1551_v32  ;;  %v222_v12 = vsel %vm1557_vm9, 0, %v220_v0  ;;  %v1157_v13 = vld [vmem:[#allocation8 + $0x28] sm:$0xff] }
  0xc7   :  { %v376_v4 = vsel %vm250_vm11, 0, %v374_v15 }
  0xc8   :  { %v1027_v28 = vadd.s32 4294967294, %v201_v18  ;;  %vm352_vm5 = vcmp.lt.s32.totalorder %v351_v23, 0  ;;  %v353_v47 = vsub.s32 0, %v351_v23 }
  0xca   :  { %vm1028_vm6 = vcmp.lt.s32.totalorder %v1027_v28, 0  ;;  %v354_v11 = vsel %vm352_vm5, %v353_v47, %v351_v23 }
  0xcb   :  { %v204_v48 = vsel %vm1028_vm6, 0, %v1027_v28  ;;  %v355_v49 = vclz %v354_v11 }
  0xcc   :  { %v205_v25 = vsub.s32 32, %v204_v48  ;;  %v209_v51 = vsub.s32 4294967266, %v204_v48  ;;  %v206_v29 = vshll.u32 %v197_v55, %v204_v48  ;;  %v702_v48 = vadd.s32 3, %v376_v4 }
  0xcd   :  { %v1030_v52 = vadd.s32 4294967294, %v355_v49 }
  0xce   :  { %v207_v53 = vshrl.u32 %v189_v50, %v205_v25  ;;  %v210_v33 = vadd.s32 127, %v209_v51  ;;  %v239_v25 = vand.u32 3, %v222_v12 }
  0xcf   :  { %vm1031_vm7 = vcmp.lt.s32.totalorder %v1030_v52, 0 }
  0xd0   :  { %v208_v36 = vor.u32 %v207_v53, %v206_v29  ;;  %v211_v41 = vshll.u32 %v210_v33, 23  ;;  %v358_v59 = vsel %vm1031_vm7, 0, %v1030_v52  ;;  %vm240_vm12 = vcmp.lt.s32.totalorder %v239_v25, 2 }
  0xd1   :  { %v359_v61 = vsub.s32 32, %v358_v59  ;;  %v363_v62 = vsub.s32 4294967266, %v358_v59  ;;  %v360_v30 = vshll.u32 %v351_v23, %v358_v59  ;;  %v547_v23 = vadd.s32 3, %v222_v12 }
  0xd2   :  { %v212_v63 = vor.u32 4788187, %v211_v41  ;;  %v215_v3 = vcvt.s32.f32 %v208_v36  ;;  %v703_v36 = vand.u32 3, %v702_v48  ;;  %v393_v41 = vand.u32 3, %v376_v4 }
  0xd3   :  { %v361_v44 = vshrl.u32 %v343_v60, %v359_v61  ;;  %v364_v1 = vadd.s32 127, %v363_v62  ;;  %v548_v52 = vand.u32 3, %v547_v23  ;;  %vm241_vm15 = vcmp.eq.s32.totalorder %v239_v25, 0 }
  0xd4   :  { %v213_v31 = vand.u32 2147483647, %v212_v63  ;;  %vm244_vm0 = vcmp.eq.s32.totalorder %v239_v25, 2  ;;  %vm704_vm2 = vcmp.lt.s32.totalorder %v703_v36, 2  ;;  %vm394_vm3 = vcmp.lt.s32.totalorder %v393_v41, 2 }
  0xd5   :  { %v362_v58 = vor.u32 %v361_v44, %v360_v30  ;;  %v365_v2 = vshll.u32 %v364_v1, 23  ;;  %vm549_vm13 = vcmp.lt.s32.totalorder %v548_v52, 2  ;;  %vm550_vm14 = vcmp.eq.s32.totalorder %v548_v52, 0 }
  0xd6   :  { %v216_v6 = vmul.f32 %v215_v3, %v213_v31  ;;  %vm553_vm1 = vcmp.eq.s32.totalorder %v548_v52, 2  ;;  %vm395_vm4 = vcmp.eq.s32.totalorder %v393_v41, 0  ;;  %vm705_vm5 = vcmp.eq.s32.totalorder %v703_v36, 0 }
  0xd7   :  { %v366_v7 = vor.u32 4788187, %v365_v2  ;;  %v369_v19 = vcvt.s32.f32 %v362_v58  ;;  %vm708_vm6 = vcmp.eq.s32.totalorder %v703_v36, 2  ;;  %vm398_vm7 = vcmp.eq.s32.totalorder %v393_v41, 2 }
  0xd8   :  { %v217_v9 = vxor.u32 2147483648, %v216_v6 }
  0xd9   :  { %v367_v14 = vand.u32 2147483647, %v366_v7 }
  0xda   :  { %v218_v22 = vsel %vm97_vm8, %v217_v9, %v216_v6  ;;  %vm238_vm8 = vweird.f32 %v1356_v10 }
  0xdb   :  { %v221_v57 = vsel %vm1557_vm9, %v1356_v10, %v218_v22  ;;  %v370_v5 = vmul.f32 %v369_v19, %v367_v14  ;;  %vm392_vm9 = vweird.f32 %v1360_v17  ;;  %v1156_v10 = vld [vmem:[#allocation8 + $0x20] sm:$0xff] }
  0xdc   :  { %v223_v37 = vmul.f32 %v221_v57, %v221_v57 }
  0xdd   :  { %v371_v27 = vxor.u32 2147483648, %v370_v5 }
  0xde   :  { %v224_v35 = vmul.f32 -0.001358992, %v223_v37  ;;  %v231_v38 = vmul.f32 -0.00019511016, %v223_v37 }
  0xdf   :  { %v372_v39 = vsel %vm251_vm10, %v371_v27, %v370_v5 }
  0xe0   :  { %v225_v40 = vadd.f32 0.041655596, %v224_v35  ;;  %v232_v42 = vadd.f32 0.008332121, %v231_v38  ;;  %v375_v43 = vsel %vm250_vm11, %v1360_v17, %v372_v39  ;;  %v1159_v35 = vld [vmem:[#allocation8 + $0x38] sm:$0xff]  ;;  %v1158_v38 = vld [vmem:[#allocation8 + $0x30] sm:$0xff] }
  0xe1   :  { %v377_v54 = vmul.f32 %v375_v43, %v375_v43  ;;  %990 = vmatpush.bf16.msra.mxu2 %v1159_v35  ;;  %v1155_v17 = vld [vmem:[#allocation8 + $0x18] sm:$0xff]  ;;  %v1176_v39 = vld [vmem:[%s1594_s3] ss:$0 sm:$0xff] }
  0xe2   :  { %v226_v45 = vmul.f32 %v225_v40, %v223_v37  ;;  %v233_v26 = vmul.f32 %v232_v42, %v223_v37 }
  0xe3   :  { %v378_v16 = vmul.f32 -0.001358992, %v377_v54  ;;  %v385_v46 = vmul.f32 -0.00019511016, %v377_v54 }
  0xe4   :  { %v227_v55 = vadd.f32 -0.4999988, %v226_v45  ;;  %v234_v20 = vadd.f32 -0.16666654, %v233_v26  ;;  %v1153_v26 = vld [vmem:[#allocation8 + $0x8] sm:$0xff] }
  0xe5   :  { %v379_v34 = vadd.f32 0.041655596, %v378_v16  ;;  %v386_v8 = vadd.f32 0.008332121, %v385_v46  ;;  %991 = vmatpush.bf16.msra.mxu2 %v1158_v38  ;;  %v1152_v46 = vld [vmem:[#allocation8] sm:$0xff] }
  0xe6   :  { %v228_v56 = vmul.f32 %v227_v55, %v223_v37  ;;  %v235_v18 = vmul.f32 %v234_v20, %v223_v37 }
  0xe7   :  { %v380_v28 = vmul.f32 %v379_v34, %v377_v54  ;;  %v387_v47 = vmul.f32 %v386_v8, %v377_v54 }
  0xe8   :  { %v236_v11 = vadd.f32 1.0, %v235_v18  ;;  %v229_v49 = vadd.f32 1.0, %v228_v56 }
  0xe9   :  { %v381_v50 = vadd.f32 -0.4999988, %v380_v28  ;;  %v388_v32 = vadd.f32 -0.16666654, %v387_v47  ;;  %992 = vmatpush.bf16.msra.mxu2 %v1157_v13 }
  0xea   :  { %v237_v51 = vmul.f32 %v236_v11, %v221_v57  ;;  %v245_v59 = vxor.u32 2147483648, %v229_v49 }
  0xeb   :  { %v382_v29 = vmul.f32 %v381_v50, %v377_v54  ;;  %v389_v53 = vmul.f32 %v388_v32, %v377_v54 }
  0xec   :  { %v242_v33 = vxor.u32 2147483648, %v237_v51  ;;  %v555_v31 = vsel %vm553_vm1, %v245_v59, %v237_v51  ;;  %v246_v3 = vsel %vm244_vm0, %v245_v59, %v237_v51 }
  0xed   :  { %v383_v60 = vadd.f32 1.0, %v382_v29  ;;  %v390_v61 = vadd.f32 1.0, %v389_v53  ;;  %993 = vmatpush.bf16.msra.mxu2 %v1156_v10 }
  0xee   :  { %v552_v30 = vsel %vm550_vm14, %v229_v49, %v242_v33  ;;  %v243_v44 = vsel %vm241_vm15, %v229_v49, %v242_v33 }
  0xef   :  { %v391_v62 = vmul.f32 %v390_v61, %v375_v43  ;;  %v399_v63 = vxor.u32 2147483648, %v383_v60  ;;  %v556_v58 = vsel %vm549_vm13, %v552_v30, %v555_v31  ;;  %v247_v2 = vsel %vm240_vm12, %v243_v44, %v246_v3  ;;  %v1154_v43 = vld [vmem:[#allocation8 + $0x10] sm:$0xff]  ;;  %v1177_v44 = vld [vmem:[%s1596_s5] ss:$0 sm:$0xff] }
  0xf0   :  { %v557_v22 = vsel %vm238_vm8, nan, %v556_v58  ;;  %v248_v5 = vsel %vm238_vm8, nan, %v247_v2 }
  0xf1   :  { %v396_v1 = vxor.u32 2147483648, %v391_v62  ;;  %v710_v7 = vsel %vm708_vm6, %v399_v63, %v391_v62  ;;  %v400_v14 = vsel %vm398_vm7, %v399_v63, %v391_v62  ;;  %994 = vmatpush.bf16.msra.mxu2 %v1155_v17 }
  0xf3   :  { %v707_v6 = vsel %vm705_vm5, %v383_v60, %v396_v1  ;;  %v397_v9 = vsel %vm395_vm4, %v383_v60, %v396_v1 }
  0xf4   :  { %v711_v19 = vsel %vm704_vm2, %v707_v6, %v710_v7  ;;  %v401_v21 = vsel %vm394_vm3, %v397_v9, %v400_v14 }
  0xf5   :  { %v712_v57 = vsel %vm392_vm9, nan, %v711_v19  ;;  %v402_v24 = vsel %vm392_vm9, nan, %v401_v21  ;;  %995 = vmatpush.bf16.msra.mxu2 %v1154_v43 }
  0xf6   :  { %v730_v37 = vpack.c.bf16 %v712_v57, %v557_v22  ;;  %v713_v27 = vpack.c.bf16 %v402_v24, %v248_v5 }
  0xf8   :  { %803 = vmatmul.bf16.vlgmr.msra.gmra.mxu0 %v730_v37  ;;  %865 = vmatmul.bf16.vlgmr.msra.gmra.mxu1 %v713_v27 }
  0xf9   :  { %996 = vmatpush.bf16.msra.mxu2 %v1153_v26 }
  0xfd   :  { %997 = vmatpush.bf16.msra.mxu2 %v1152_v46 }
 0x175   :  { %v804_v0 = vpop.f32.mrf.mxu0  ;;  %v866_v40 = vpop.f32.mrf.mxu1 }
 0x176   :  { %v867_v42 = vadd.f32 %v866_v40, %v804_v0 }
 0x178   :  { %v875_v54 = vadd.f32 %v1176_v39, %v867_v42 }
 0x17a   :  { %v1102_v45 = vmul.f32 -1.442695, %v875_v54 }
 0x17c   :  { %1180 = vpow2.f32 %v1102_v45 }
 0x17d   :  { %v806_v15 = vpop.f32.mrf.mxu0  ;;  %v868_v12 = vpop.f32.mrf.mxu1 }
 0x17e   :  { %v869_v16 = vadd.f32 %v868_v12, %v806_v15 }
 0x180   :  { %v876_v55 = vadd.f32 %v1176_v39, %v869_v16 }
 0x182   :  { %v1181_v20 = vpop.eup %1180  ;;  %v1103_v4 = vmul.f32 -1.442695, %v876_v55 }
 0x183   :  { %v883_v34 = vadd.f32 1.0, %v1181_v20 }
 0x184   :  { %1182 = vpow2.f32 %v1103_v4 }
 0x185   :  { %1184 = vrcp.f32 %v883_v34  ;;  %v896_v50 = vand.u32 2147483648, %v883_v34  ;;  %vm890_vm11 = vweird.f32 %v883_v34  ;;  %v894_v32 = vand.u32 2147483647, %v883_v34 }
 0x187   :  { %v897_v33 = vor.u32 1.1754944e-38, %v896_v50  ;;  %vm895_vm14 = vcmp.eq.f32.partialorder %v894_v32, 8.507059e+37 }
 0x18a   :  { %v1183_v8 = vpop.eup %1182 }
 0x18b   :  { %v1185_v56 = vpop.eup %1184  ;;  %v884_v18 = vadd.f32 1.0, %v1183_v8 }
 0x18c   :  { %v886_v23 = vmul.f32 %v1185_v56, %v883_v34  ;;  %vm891_vm10 = vweird.f32 %v1185_v56 }
 0x18d   :  { %1186 = vrcp.f32 %v884_v18  ;;  %vm892_vm12 = vmor %vm890_vm11, %vm891_vm10  ;;  %v911_v51 = vand.u32 2147483648, %v884_v18  ;;  %v909_v53 = vand.u32 2147483647, %v884_v18  ;;  %vm905_vm15 = vweird.f32 %v884_v18 }
 0x18e   :  { %v887_v28 = vsub.f32 1.0, %v886_v23 }
 0x18f   :  { %v912_v59 = vor.u32 1.1754944e-38, %v911_v51  ;;  %vm910_vm1 = vcmp.eq.f32.partialorder %v909_v53, 8.507059e+37 }
 0x190   :  { %v888_v47 = vmul.f32 %v1185_v56, %v887_v28 }
 0x192   :  { %v889_v48 = vadd.f32 %v1185_v56, %v888_v47 }
 0x193   :  { %v1187_v11 = vpop.eup %1186 }
 0x194   :  { %v901_v49 = vmul.f32 %v1187_v11, %v884_v18  ;;  %v893_v52 = vsel %vm892_vm12, %v1185_v56, %v889_v48  ;;  %vm906_vm13 = vweird.f32 %v1187_v11 }
 0x195   :  { %v898_v41 = vsel %vm895_vm14, %v897_v33, %v893_v52  ;;  %vm907_vm0 = vmor %vm905_vm15, %vm906_vm13 }
 0x196   :  { %v902_v25 = vsub.f32 1.0, %v901_v49  ;;  %v915_v62 = vmul.f32 %v898_v41, %v875_v54 }
 0x198   :  { %v903_v29 = vmul.f32 %v1187_v11, %v902_v25 }
 0x19a   :  { %v904_v36 = vadd.f32 %v1187_v11, %v903_v29 }
 0x19c   :  { %v908_v60 = vsel %vm907_vm0, %v1187_v11, %v904_v36 }
 0x19d   :  { %v913_v61 = vsel %vm910_vm1, %v912_v59, %v908_v60 }
 0x19e   :  { %v916_v63 = vmul.f32 %v913_v61, %v876_v55 }
 0x1a0   :  { %v921_v30 = vpack.c.bf16 %v916_v63, %v915_v62 }
 0x1a2   :  { %998 = vmatmul.bf16.vlgmr.msra.gmra.mxu2 %v921_v30 }
 0x225   :  { %v999_v1 = vpop.f32.mrf.mxu2 }
 0x226   :  { %v1000_v31 = vadd.f32 %v1177_v44, %v999_v1 }
 0x228   :  { %1004 = vst [vmem:[#allocation9] sm:$0xff] %v1000_v31 }
 0x22d   :  { %v1001_v3 = vpop.f32.mrf.mxu2 }
 0x22e   :  { %v1002_v58 = vadd.f32 %v1177_v44, %v1001_v3 }
 0x230   :  { %1005 = vst [vmem:[#allocation9 + $0x8] sm:$0xff] %v1002_v58 }
 0x231   :  { %1018 = dma.vmem_to_hbm [thread:$0]  %s1011_s18, 256, %s1013_s21, [#allocation5], %s1303_s22, %s1303_s22, %s1304_s23  }
 0x232   :  { %1288 = dma.done.wait [#allocation5], 256  }
 0x233   :  { %1289 = vsyncadd [#allocation5], 4294967040 }
 0x234   :  { %1023 = vsyncpa [#allocation4], 1 }
 0x235   :  { %1024 = vsyncpa [#allocation7], 1 }
 0x236   :  { %1025 = vsyncpa [#allocation5], 1 }

</bundles_post_ra>
